<compile_context>
chip_gen: v5e
topology: v5e:2x2
jax: 0.10.0
libtpu: 0.0.40
codegen_flags: <defaults>
</compile_context>

<pallas_src>
from collections import OrderedDict
from functools import partial

import numpy as np
import jax
import jax.numpy as jnp
from jax.experimental import pallas as pl
from jax.experimental.pallas import tpu as pltpu


_LANE = 128      # TPU lane width
_CHUNK = 512     # in-kernel lane chunk (keeps per-chunk live values tiny)


def _round_up(x, m):
    return -(-x // m) * m


def _vmem_capacity_bytes(default=64 * 1024 * 1024):
    """Per-core VMEM capacity; conservative v7x-sized fallback."""
    try:
        return int(pltpu.get_tpu_info().vmem_capacity_bytes)
    except Exception:
        return default


def _vmem_limit_bytes():
    """Raised scoped-VMEM limit: ~64 MiB on v5e/v6e, ~32 MiB on v7x."""
    cap = _vmem_capacity_bytes()
    return int(min(64 * 1024 * 1024, max(32 * 1024 * 1024, cap // 2)))


def _pick_row_tile(n, c_rows, max_row_tile):
    """Pick the lane tile TN.

    * as large as a conservative VMEM budget allows (double-buffered f32
      slab + output, well under 16 MiB even on v7x's 64 MiB/TC),
    * capped at `max_row_tile` (unrolled-body size / compile time),
    * shrunk to keep >= 2 grid steps (both v7x TensorCores busy),
    * nudged toward an even grid-step count when cheap.
    Invariant: TN is a multiple of _CHUNK when TN > _CHUNK, else of _LANE.
    """
    cap = max(_CHUNK, (int(max_row_tile) // _CHUNK) * _CHUNK)
    budget = min(16 * 1024 * 1024, _vmem_capacity_bytes() // 4)
    per_lane = 2 * (c_rows + 1) * 4                    # 2 buffers, f32
    tn = max(_CHUNK, (budget // per_lane) // _CHUNK * _CHUNK)
    tn = min(tn, cap)
    while tn > _LANE and pl.cdiv(n, tn) < 2:
        tn //= 2
        if tn >= _CHUNK:
            tn = (tn // _CHUNK) * _CHUNK
        else:
            tn = max(_LANE, (tn // _LANE) * _LANE)
    steps = pl.cdiv(n, tn)
    if steps > 1 and steps % 2 == 1:                   # prefer even steps (v7x)
        cand = _round_up(pl.cdiv(n, steps + 1), _CHUNK)
        if 0 < cand <= tn and pl.cdiv(n, cand) % 2 == 0:
            tn = cand
    return int(tn)


# ----------------------------------------------------------------------------
# Kernel factory: specialized to the (static) module layout
# ----------------------------------------------------------------------------
def _make_mixedfx_kernel(num_fixed, rf_sizes, tn, ck):
    """Builds the fused kernel body.

    Ref order:
      slab_ref : (C+G, TN) f32  feature-major tile; rows =
                 [X[:,ff_idx] ; X[:,rf_idx[gf0]] ; ... ; bitcast(gidx rows)]
      wb_ref   : (F+1,) f32 SMEM  fixed-effects weights then bias
      tbl_g    : (NG_g, R_g+1) f32  random-effects table per gf (resident)
      o_ref    : (1, TN) f32   lane-dense output tile
    """
    n_gf = len(rf_sizes)
    offs, off = [], num_fixed
    for r in rf_sizes:
        offs.append(off)
        off += r
    gid_row0 = off                       # gidx rows sit below the feature rows
    assert tn % ck == 0
    n_chunks = tn // ck

    def kernel(slab_ref, wb_ref, *rest):
        tbl_refs = rest[:n_gf]
        o_ref = rest[n_gf]

        # Hoist the tiny random-effects tables and their lane-broadcasts out
        # of the chunk loop (JAX does not CSE broadcast_in_dim inside loops).
        tbl_cols = []
        for g in range(n_gf):
            tbl = tbl_refs[g][...]                                # (NG, R+1)
            ng = tbl.shape[0]
            tbl_cols.append([jnp.broadcast_to(tbl[:, j:j + 1], (ng, ck))
                             for j in range(rf_sizes[g] + 1)])

        # Static chunk loop: per-chunk live set is a handful of vregs, so the
        # (C, TN) tile is streamed instead of materialized (no spills).
        for cc in range(n_chunks):
            lo = cc * ck

            # -- fixed effects: SMEM-scalar x vector FMAs (no MXU, no XLU) ---
            acc = jnp.zeros((1, ck), jnp.float32)
            for j in range(num_fixed):
                acc = acc + wb_ref[j] * slab_ref[j:j + 1, lo:lo + ck]
            acc = acc + wb_ref[num_fixed]                         # bias

            # -- random effects: group-level predictor + ONE masked sublane
            #    reduce per grouping factor --------------------------------
            for g in range(n_gf):
                cols_g = tbl_cols[g]
                ng = cols_g[0].shape[0]
                gidx = pltpu.bitcast(
                    slab_ref[gid_row0 + g:gid_row0 + g + 1, lo:lo + ck],
                    jnp.int32)                                    # (1, ck)
                contrib = cols_g[0]                               # intercepts
                for j in range(rf_sizes[g]):
                    contrib = contrib + (
                        cols_g[j + 1] *
                        slab_ref[offs[g] + j:offs[g] + j + 1, lo:lo + ck])
                sel = (jax.lax.broadcasted_iota(jnp.int32, (ng, ck), 0)
                       == gidx)                                   # exact 1-hot
                acc = acc + jnp.sum(jnp.where(sel, contrib, 0.0),
                                    axis=0, keepdims=True)

            o_ref[0:1, lo:lo + ck] = acc.astype(o_ref.dtype)      # lane-dense
    return kernel


# ----------------------------------------------------------------------------
# Fused (slab build + pallas_call) forward, one XLA program
# ----------------------------------------------------------------------------
@partial(jax.jit, static_argnames=("col_idx", "num_fixed", "rf_sizes",
                                   "tn", "vmem_limit"))
def _mixedfx_forward_impl(X, gidx, wb, tables, *, col_idx, num_fixed,
                          rf_sizes, tn, vmem_limit):
    n = X.shape[0]

    # Build the feature-major slab in one fused XLA pass (no separate host
    # gather/transpose/pad dispatches): rows = feature cols, then the int32
    # group-index rows bitcast into the same f32 array (single DMA stream).
    cols = jnp.asarray(col_idx, dtype=jnp.int32)
    feats = jnp.take(X.astype(jnp.float32), cols, axis=1).T          # (C, N)
    gid_f = jax.lax.bitcast_convert_type(gidx.astype(jnp.int32),
                                         jnp.float32)                # (G, N)
    slab = jnp.concatenate([feats, gid_f], axis=0)                   # (C+G, N)

    n_cols = n
    if n < tn:            # degenerate tiny-N case: block must not exceed array
        n_cols = tn
        slab = jnp.pad(slab, ((0, 0), (0, tn - n)))

    c_rows = slab.shape[0]
    ck = min(_CHUNK, tn)
    kernel = _make_mixedfx_kernel(num_fixed, rf_sizes, tn, ck)

    in_specs = [
        pl.BlockSpec((c_rows, tn), lambda i: (0, i)),       # data slab tile
        pl.BlockSpec(memory_space=pltpu.SMEM),              # weights + bias
    ] + [pl.BlockSpec(tuple(t.shape), lambda i: (0, 0))     # resident tables
         for t in tables]

    out = pl.pallas_call(
        kernel,
        out_shape=jax.ShapeDtypeStruct((1, n_cols), jnp.float32),
        grid=(pl.cdiv(n_cols, tn),),
        in_specs=in_specs,
        out_specs=pl.BlockSpec((1, tn), lambda i: (0, i)),   # lane-dense output
        compiler_params=pltpu.CompilerParams(
            dimension_semantics=("parallel",),
            vmem_limit_bytes=int(vmem_limit)),
    )(slab, wb, *tables)
    # padding / partial-block lanes are discarded here
    return out[0, :n]


# ----------------------------------------------------------------------------
# Module wrapper (parameter setup + host-side glue)
# ----------------------------------------------------------------------------
class MixedEffectsModuleJAX:
    def __init__(self, fixeff_features, raneff_features, key,
                 covariance_parameterization="log_cholesky",
                 re_scale_penalty=0.0, verbose=1, max_row_tile=16384):
        self.verbose = verbose
        self.max_row_tile = int(max_row_tile)
        if isinstance(fixeff_features, int):
            num_fixed = fixeff_features
            self.ff_idx = list(range(fixeff_features))
        else:
            num_fixed = len(fixeff_features)
            self.ff_idx = list(fixeff_features)
        assert num_fixed >= 1, "at least one fixed-effects feature expected"

        if not isinstance(raneff_features, dict):
            raneff_features = {"group": raneff_features}
        self.rf_idx = OrderedDict()
        for gf, rf in raneff_features.items():
            self.rf_idx[gf] = list(range(rf)) if isinstance(rf, int) else list(rf)

        k_w, k_b, k_cov = jax.random.split(key, 3)
        # fixed_effects_nn = Linear(num_fixed, 1); weight <- 0.01 * randn
        self.fe_weight = (0.01 * jax.random.normal(k_w, (num_fixed,))
                          ).astype(jnp.float32).reshape(num_fixed, 1)
        bound = 1.0 / np.sqrt(num_fixed)
        self.fe_bias = jax.random.uniform(
            k_b, (1,), minval=-bound, maxval=bound).astype(jnp.float32)
        # packed [w_0..w_{F-1}, bias] vector that lives in SMEM in-kernel
        self._wb = jnp.concatenate([self.fe_weight[:, 0], self.fe_bias]
                                   ).astype(jnp.float32)

        # random-effects covariance params (unused by forward(res_per_gf=...),
        # kept for structural fidelity with _init_re_cov_params)
        self.covariance_parameterization = covariance_parameterization.lower()
        self._re_cov_params = {}
        for gf, idx in self.rf_idx.items():
            rank = len(idx) + 1
            n_off = rank * (rank - 1) // 2
            k_cov, k1, k2 = jax.random.split(k_cov, 3)
            self._re_cov_params[f"{gf}_cholesky_log_diag"] = \
                0.1 * jax.random.normal(k1, (rank,), dtype=jnp.float32)
            self._re_cov_params[f"{gf}_cholesky_off_diag"] = \
                0.1 * jax.random.normal(k2, (n_off,), dtype=jnp.float32)

        if not isinstance(re_scale_penalty, dict):
            re_scale_penalty = {gf: float(re_scale_penalty) for gf in self.rf_idx}
        self.re_scale_penalty = re_scale_penalty

        self._vmem_limit = _vmem_limit_bytes()

    @property
    def grouping_factors(self):
        return list(self.rf_idx.keys())

    def forward(self, X, group_ids, res_per_gf):
        X = jnp.asarray(X, jnp.float32)
        n = X.shape[0]
        gfs = self.grouping_factors

        group_ids = np.asarray(group_ids)
        if group_ids.ndim == 1:
            group_ids = group_ids[:, None]
        assert group_ids.shape == (n, len(gfs))

        if not isinstance(res_per_gf, dict):
            res_per_gf = {gfs[0]: res_per_gf}

        # host-side glue (mirrors the torch code's np.unique bookkeeping)
        gidx_rows, tables, rf_sizes = [], [], []
        for i, gf in enumerate(gfs):
            uniq, inv = np.unique(group_ids[:, i], return_inverse=True)
            tbl = jnp.asarray(res_per_gf[gf], jnp.float32)
            # res_per_gf rows must correspond to the sorted unique group ids
            assert tbl.shape == (len(uniq), len(self.rf_idx[gf]) + 1), (
                f"res_per_gf[{gf!r}] must have one row per sorted unique "
                f"group id: expected {(len(uniq), len(self.rf_idx[gf]) + 1)}, "
                f"got {tuple(tbl.shape)}")
            gidx_rows.append(np.asarray(inv, dtype=np.int32))
            tables.append(tbl)
            rf_sizes.append(len(self.rf_idx[gf]))
        gidx_t = jnp.asarray(np.stack(gidx_rows, axis=0))      # (G, N) int32

        col_idx = tuple(int(c) for c in self.ff_idx) + \
            tuple(int(c) for gf in gfs for c in self.rf_idx[gf])
        c_rows = len(col_idx) + len(gfs)
        tn = _pick_row_tile(n, c_rows, self.max_row_tile)

        return _mixedfx_forward_impl(
            X, gidx_t, self._wb, tuple(tables),
            col_idx=col_idx, num_fixed=len(self.ff_idx),
            rf_sizes=tuple(rf_sizes), tn=tn, vmem_limit=self._vmem_limit)


# ----------------------------------------------------------------------------
# Pure-JAX reference mirroring the PyTorch forward (for the in-script check)
# ----------------------------------------------------------------------------
def _reference_forward(mod, X, group_ids, res_per_gf):
    X = jnp.asarray(X, jnp.float32)
    group_ids = np.asarray(group_ids)
    if group_ids.ndim == 1:
        group_ids = group_ids[:, None]
    if not isinstance(res_per_gf, dict):
        res_per_gf = {mod.grouping_factors[0]: res_per_gf}
    w = mod.fe_weight[:, 0]
    yhat = (jnp.sum(X[:, np.asarray(mod.ff_idx)] * w[None, :], axis=1)
            + mod.fe_bias[0])
    for i, (gf, col_idx) in enumerate(mod.rf_idx.items()):
        Xr = jnp.concatenate([jnp.ones((X.shape[0], 1), jnp.float32),
                              X[:, np.asarray(col_idx)]], axis=1)
        _, gidx = np.unique(group_ids[:, i], return_inverse=True)
        betas = jnp.asarray(res_per_gf[gf], jnp.float32)[np.asarray(gidx)]
        yhat = yhat + jnp.sum(Xr * betas, axis=1)
    return yhat


# ----------------------------------------------------------------------------
if __name__ == "__main__":
    key = jax.random.PRNGKey(0)
    k_mod, k_x, k_r1, k_r2, k_g1, k_g2 = jax.random.split(key, 6)

    N, D = 520, 8            # N rows (non tile-multiple on purpose), D columns
    NG_UNIT, NG_SITE = 5, 3  # groups per grouping factor

    mod = MixedEffectsModuleJAX(
        fixeff_features=4,                       # fixed-effects cols 0..3
        raneff_features={"unit": [4, 5, 6],      # 2 grouping factors
                         "site": [6, 7]},        # (col 6 shared on purpose)
        key=k_mod,
    )

    X = jax.random.normal(k_x, (N, D), dtype=jnp.float32)

    unit_ids = np.array(jax.random.randint(k_g1, (N,), 0, NG_UNIT))
    site_ids = np.array(jax.random.randint(k_g2, (N,), 0, NG_SITE))
    unit_ids[:NG_UNIT] = np.arange(NG_UNIT)      # ensure every group appears
    site_ids[:NG_SITE] = np.arange(NG_SITE)
    group_ids = np.stack([unit_ids, site_ids], axis=1)

    res_per_gf = {
        "unit": 0.5 * jax.random.normal(k_r1, (NG_UNIT, 3 + 1), dtype=jnp.float32),
        "site": 0.5 * jax.random.normal(k_r2, (NG_SITE, 2 + 1), dtype=jnp.float32),
    }

    yhat = mod.forward(X, group_ids, res_per_gf)
    yhat = jax.block_until_ready(yhat)

    yref = _reference_forward(mod, X, group_ids, res_per_gf)
    np.testing.assert_allclose(np.asarray(yhat), np.asarray(yref),
                               rtol=1e-5, atol=1e-5)
    assert yhat.shape == (N,) and yhat.dtype == jnp.float32

    print("KERNEL_OK")
</pallas_src>

<mosaic_0001>
module attributes {stable_mosaic.version = 11 : i64} {
  func.func @kernel(%arg0: i32, %arg1: memref<11x512xf32, #tpu.memory_space<vmem>>, %arg2: memref<5xf32, #tpu.memory_space<smem>>, %arg3: memref<5x4xf32, #tpu.memory_space<vmem>>, %arg4: memref<3x3xf32, #tpu.memory_space<vmem>>, %arg5: memref<1x512xf32, #tpu.memory_space<vmem>>) attributes {dimension_semantics = [#tpu.dimension_semantics<parallel>], iteration_bounds = array<i64: 2>, scalar_prefetch = 0 : i64, scratch_operands = 0 : i64, tpu.core_type = #tpu.core_type<tc>, window_params = [{transform_indices = @transform_0, window_bounds = array<i64: 11, 512>}, {transform_indices = @transform_1, window_bounds = array<i64: 5>}, {pipeline_mode = #tpu.pipeline_mode<synchronous>, transform_indices = @transform_2, window_bounds = array<i64: 5, 4>}, {pipeline_mode = #tpu.pipeline_mode<synchronous>, transform_indices = @transform_3, window_bounds = array<i64: 3, 3>}, {transform_indices = @transform_4, window_bounds = array<i64: 1, 512>}]} {
    %c0 = arith.constant 0 : index
    %c0_0 = arith.constant 0 : index
    %0 = vector.load %arg3[%c0, %c0_0] : memref<5x4xf32, #tpu.memory_space<vmem>>, vector<5x4xf32>
    %1 = vector.extract_strided_slice %0 {offsets = [0, 0], sizes = [5, 1], strides = [1, 1]} : vector<5x4xf32> to vector<5x1xf32>
    %2 = vector.shape_cast %1 : vector<5x1xf32> to vector<5x1xf32>
    %3 = vector.broadcast %2 : vector<5x1xf32> to vector<5x512xf32>
    %4 = vector.extract_strided_slice %0 {offsets = [0, 1], sizes = [5, 1], strides = [1, 1]} : vector<5x4xf32> to vector<5x1xf32>
    %5 = vector.shape_cast %4 : vector<5x1xf32> to vector<5x1xf32>
    %6 = vector.broadcast %5 : vector<5x1xf32> to vector<5x512xf32>
    %7 = vector.extract_strided_slice %0 {offsets = [0, 2], sizes = [5, 1], strides = [1, 1]} : vector<5x4xf32> to vector<5x1xf32>
    %8 = vector.shape_cast %7 : vector<5x1xf32> to vector<5x1xf32>
    %9 = vector.broadcast %8 : vector<5x1xf32> to vector<5x512xf32>
    %10 = vector.extract_strided_slice %0 {offsets = [0, 3], sizes = [5, 1], strides = [1, 1]} : vector<5x4xf32> to vector<5x1xf32>
    %11 = vector.shape_cast %10 : vector<5x1xf32> to vector<5x1xf32>
    %12 = vector.broadcast %11 : vector<5x1xf32> to vector<5x512xf32>
    %c0_1 = arith.constant 0 : index
    %c0_2 = arith.constant 0 : index
    %13 = vector.load %arg4[%c0_1, %c0_2] : memref<3x3xf32, #tpu.memory_space<vmem>>, vector<3x3xf32>
    %14 = vector.extract_strided_slice %13 {offsets = [0, 0], sizes = [3, 1], strides = [1, 1]} : vector<3x3xf32> to vector<3x1xf32>
    %15 = vector.shape_cast %14 : vector<3x1xf32> to vector<3x1xf32>
    %16 = vector.broadcast %15 : vector<3x1xf32> to vector<3x512xf32>
    %17 = vector.extract_strided_slice %13 {offsets = [0, 1], sizes = [3, 1], strides = [1, 1]} : vector<3x3xf32> to vector<3x1xf32>
    %18 = vector.shape_cast %17 : vector<3x1xf32> to vector<3x1xf32>
    %19 = vector.broadcast %18 : vector<3x1xf32> to vector<3x512xf32>
    %20 = vector.extract_strided_slice %13 {offsets = [0, 2], sizes = [3, 1], strides = [1, 1]} : vector<3x3xf32> to vector<3x1xf32>
    %21 = vector.shape_cast %20 : vector<3x1xf32> to vector<3x1xf32>
    %22 = vector.broadcast %21 : vector<3x1xf32> to vector<3x512xf32>
    %cst = arith.constant 0.000000e+00 : f32
    %23 = vector.broadcast %cst : f32 to vector<1x512xf32>
    %c0_3 = arith.constant 0 : index
    %24 = memref.load %arg2[%c0_3] : memref<5xf32, #tpu.memory_space<smem>>
    %c0_4 = arith.constant 0 : index
    %c0_5 = arith.constant 0 : index
    %25 = vector.load %arg1[%c0_4, %c0_5] : memref<11x512xf32, #tpu.memory_space<vmem>>, vector<1x512xf32>
    %26 = vector.broadcast %24 : f32 to vector<1x512xf32>
    %27 = arith.mulf %26, %25 : vector<1x512xf32>
    %28 = arith.addf %23, %27 : vector<1x512xf32>
    %c1 = arith.constant 1 : index
    %29 = memref.load %arg2[%c1] : memref<5xf32, #tpu.memory_space<smem>>
    %c1_6 = arith.constant 1 : index
    %c0_7 = arith.constant 0 : index
    %30 = vector.load %arg1[%c1_6, %c0_7] : memref<11x512xf32, #tpu.memory_space<vmem>>, vector<1x512xf32>
    %31 = vector.broadcast %29 : f32 to vector<1x512xf32>
    %32 = arith.mulf %31, %30 : vector<1x512xf32>
    %33 = arith.addf %28, %32 : vector<1x512xf32>
    %c2 = arith.constant 2 : index
    %34 = memref.load %arg2[%c2] : memref<5xf32, #tpu.memory_space<smem>>
    %c2_8 = arith.constant 2 : index
    %c0_9 = arith.constant 0 : index
    %35 = vector.load %arg1[%c2_8, %c0_9] : memref<11x512xf32, #tpu.memory_space<vmem>>, vector<1x512xf32>
    %36 = vector.broadcast %34 : f32 to vector<1x512xf32>
    %37 = arith.mulf %36, %35 : vector<1x512xf32>
    %38 = arith.addf %33, %37 : vector<1x512xf32>
    %c3 = arith.constant 3 : index
    %39 = memref.load %arg2[%c3] : memref<5xf32, #tpu.memory_space<smem>>
    %c3_10 = arith.constant 3 : index
    %c0_11 = arith.constant 0 : index
    %40 = vector.load %arg1[%c3_10, %c0_11] : memref<11x512xf32, #tpu.memory_space<vmem>>, vector<1x512xf32>
    %41 = vector.broadcast %39 : f32 to vector<1x512xf32>
    %42 = arith.mulf %41, %40 : vector<1x512xf32>
    %43 = arith.addf %38, %42 : vector<1x512xf32>
    %c4 = arith.constant 4 : index
    %44 = memref.load %arg2[%c4] : memref<5xf32, #tpu.memory_space<smem>>
    %45 = vector.broadcast %44 : f32 to vector<1x512xf32>
    %46 = arith.addf %43, %45 : vector<1x512xf32>
    %c9 = arith.constant 9 : index
    %c0_12 = arith.constant 0 : index
    %47 = vector.load %arg1[%c9, %c0_12] : memref<11x512xf32, #tpu.memory_space<vmem>>, vector<1x512xf32>
    %48 = tpu.bitcast %47 : vector<1x512xf32> -> vector<1x512xi32>
    %c4_13 = arith.constant 4 : index
    %c0_14 = arith.constant 0 : index
    %49 = vector.load %arg1[%c4_13, %c0_14] : memref<11x512xf32, #tpu.memory_space<vmem>>, vector<1x512xf32>
    %50 = vector.broadcast %49 : vector<1x512xf32> to vector<5x512xf32>
    %51 = arith.mulf %6, %50 : vector<5x512xf32>
    %52 = arith.addf %3, %51 : vector<5x512xf32>
    %c5 = arith.constant 5 : index
    %c0_15 = arith.constant 0 : index
    %53 = vector.load %arg1[%c5, %c0_15] : memref<11x512xf32, #tpu.memory_space<vmem>>, vector<1x512xf32>
    %54 = vector.broadcast %53 : vector<1x512xf32> to vector<5x512xf32>
    %55 = arith.mulf %9, %54 : vector<5x512xf32>
    %56 = arith.addf %52, %55 : vector<5x512xf32>
    %c6 = arith.constant 6 : index
    %c0_16 = arith.constant 0 : index
    %57 = vector.load %arg1[%c6, %c0_16] : memref<11x512xf32, #tpu.memory_space<vmem>>, vector<1x512xf32>
    %58 = vector.broadcast %57 : vector<1x512xf32> to vector<5x512xf32>
    %59 = arith.mulf %12, %58 : vector<5x512xf32>
    %60 = arith.addf %56, %59 : vector<5x512xf32>
    %61 = tpu.iota {dimensions = array<i32: 0>} : vector<5x512xi32>
    %62 = vector.broadcast %48 : vector<1x512xi32> to vector<5x512xi32>
    %63 = arith.cmpi eq, %61, %62 : vector<5x512xi32>
    %cst_17 = arith.constant 0.000000e+00 : f32
    %64 = vector.broadcast %cst_17 : f32 to vector<5x512xf32>
    %65 = arith.select %63, %60, %64 : vector<5x512xi1>, vector<5x512xf32>
    %cst_18 = arith.constant dense<0.000000e+00> : vector<512xf32>
    %66 = vector.multi_reduction <add>, %65, %cst_18 [0] : vector<5x512xf32> to vector<512xf32>
    %67 = vector.shape_cast %66 : vector<512xf32> to vector<1x512xf32>
    %68 = arith.addf %46, %67 : vector<1x512xf32>
    %c10 = arith.constant 10 : index
    %c0_19 = arith.constant 0 : index
    %69 = vector.load %arg1[%c10, %c0_19] : memref<11x512xf32, #tpu.memory_space<vmem>>, vector<1x512xf32>
    %70 = tpu.bitcast %69 : vector<1x512xf32> -> vector<1x512xi32>
    %c7 = arith.constant 7 : index
    %c0_20 = arith.constant 0 : index
    %71 = vector.load %arg1[%c7, %c0_20] : memref<11x512xf32, #tpu.memory_space<vmem>>, vector<1x512xf32>
    %72 = vector.broadcast %71 : vector<1x512xf32> to vector<3x512xf32>
    %73 = arith.mulf %19, %72 : vector<3x512xf32>
    %74 = arith.addf %16, %73 : vector<3x512xf32>
    %c8 = arith.constant 8 : index
    %c0_21 = arith.constant 0 : index
    %75 = vector.load %arg1[%c8, %c0_21] : memref<11x512xf32, #tpu.memory_space<vmem>>, vector<1x512xf32>
    %76 = vector.broadcast %75 : vector<1x512xf32> to vector<3x512xf32>
    %77 = arith.mulf %22, %76 : vector<3x512xf32>
    %78 = arith.addf %74, %77 : vector<3x512xf32>
    %79 = tpu.iota {dimensions = array<i32: 0>} : vector<3x512xi32>
    %80 = vector.broadcast %70 : vector<1x512xi32> to vector<3x512xi32>
    %81 = arith.cmpi eq, %79, %80 : vector<3x512xi32>
    %cst_22 = arith.constant 0.000000e+00 : f32
    %82 = vector.broadcast %cst_22 : f32 to vector<3x512xf32>
    %83 = arith.select %81, %78, %82 : vector<3x512xi1>, vector<3x512xf32>
    %cst_23 = arith.constant dense<0.000000e+00> : vector<512xf32>
    %84 = vector.multi_reduction <add>, %83, %cst_23 [0] : vector<3x512xf32> to vector<512xf32>
    %85 = vector.shape_cast %84 : vector<512xf32> to vector<1x512xf32>
    %86 = arith.addf %68, %85 : vector<1x512xf32>
    %c0_24 = arith.constant 0 : index
    %c0_25 = arith.constant 0 : index
    %87 = vector.load %arg5[%c0_24, %c0_25] : memref<1x512xf32, #tpu.memory_space<vmem>>, vector<1x512xf32>
    tpu.vector_store %arg5[%c0_24, %c0_25], %86 {strides = array<i32>} : memref<1x512xf32, #tpu.memory_space<vmem>>, vector<1x512xf32>,
    return
  }
  func.func @transform_0(%arg0: i32) -> (i32, i32) {
    %c0_i32 = arith.constant 0 : i32
    %c0_i32_0 = arith.constant 0 : i32
    return %c0_i32, %arg0 : i32, i32
  }
  func.func @transform_1(%arg0: i32) -> i32 {
    %c0_i32 = arith.constant 0 : i32
    %c0_i32_0 = arith.constant 0 : i32
    return %c0_i32 : i32
  }
  func.func @transform_2(%arg0: i32) -> (i32, i32) {
    %c0_i32 = arith.constant 0 : i32
    %c0_i32_0 = arith.constant 0 : i32
    %c0_i32_1 = arith.constant 0 : i32
    return %c0_i32, %c0_i32_0 : i32, i32
  }
  func.func @transform_3(%arg0: i32) -> (i32, i32) {
    %c0_i32 = arith.constant 0 : i32
    %c0_i32_0 = arith.constant 0 : i32
    %c0_i32_1 = arith.constant 0 : i32
    return %c0_i32, %c0_i32_0 : i32, i32
  }
  func.func @transform_4(%arg0: i32) -> (i32, i32) {
    %c0_i32 = arith.constant 0 : i32
    %c0_i32_0 = arith.constant 0 : i32
    return %c0_i32, %arg0 : i32, i32
  }
}

</mosaic_0001>

<bundles_post_ra>
// kernel: _mixedfx_forward_impl.1
= control target key start
LH: loop header
LB: loop body
LE: loop exit
PB: predicated region body
PF: predicated region fallthrough
CT: control target
= control target key end

     0   :  { %9 = vsyncpa [#allocation4], 0  ;;  %s2021_s15 = smov 0   ;;  %s2023_s16 = smov 0   ;;  %s2788_s0 = inlined_call_operand.vmem [shape: f32[11,520], index: 0, kind: input, shape index: {}]   ;;  %s2789_s1 = inlined_call_operand.vmem [shape: f32[5], index: 1, kind: input, shape index: {}]   ;;  %s2790_s2 = inlined_call_operand.vmem [shape: f32[5,4], index: 2, kind: input, shape index: {}]   ;;  %s2791_s3 = inlined_call_operand.vmem [shape: f32[3,3], index: 3, kind: input, shape index: {}]   ;;  %s2792_s4 = inlined_call_operand.vmem [shape: f32[1,520], index: 4, kind: output, shape index: {}]  }
   0x1   :  { %s2025_s17 = smov 0  }
   0x2 LB: > { %s2037_s18 = sadd.s32 4294967295, %s1857_s17   ;;  %s2040_s19 = sadd.s32 1, %s1857_s17   ;;  %s1857_s17 = sphi %s2025_s17, %s2818_s17   ;;  %s1853_s16 = sphi %s2023_s16, %s2817_s16   ;;  %s1849_s15 = sphi %s2021_s15, %s2816_s15  }
   0x3   : > { %s19_s20 = ssub.s32 %s1857_s17, %s2040_s19  ;;  %s22_s21 = sadd.s32 1, %s1853_s16 }
   0x4   : > { %p20_p0 = scmp.eq.s32.totalorder %s19_s20, 0  ;;  %p29_p1 = scmp.ne.s32.totalorder %s1853_s16, %s1849_s15 }
   0x5   : > { %p30_p2 = scmp.eq.s32.totalorder %s1857_s17, 0  ;;  %p122_p3 = scmp.eq.s32.totalorder %s2037_s18, 1 }
   0x6   : > { %s2050_s22 = scalar_select %p20_p0, %s1853_s16, %s22_s21  }
   0x7   : > { %p2052_p4 = por %p30_p2, %p29_p1  ;;  %p2056_p5 = por %p122_p3, %p29_p1 }
   0x8   : > { %p1294_p6 = scmp.ge.s32.totalorder %s1857_s17, 1  ;;  %p135_p7 = scmp.lt.s32.totalorder %s1857_s17, 3 }
   0x9   : > { %p1389_p8 = scmp.eq.s32.totalorder %s2037_s18, 0  ;;  %s147_s28 = sshll.u32 %s2789_s1, 4  ;;  %s148_s28 = int_to_ptr.vmem [resolvable:$true] %s147_s28 }
   0xa   : > { %p2063_p9 = pnand %p1294_p6, %p135_p7  ;;  %s1987_s29 = smov [#allocation3]  }
   0xb   : > { %p1296_p12 = scmp.ge.s32.totalorder %s1857_s17, 2 }
   0xc   : > { %p1385_p10 = pneg %p2063_p9 }
   0xd   : > { %160 = sbr.rel (%p1296_p12) target bundleno = 149 (0x95), region = 28 }
   0xe   : > { %p1386_p11 = pnand %p1389_p8, %p1385_p10 }
  0x10   : > { %1388 = dma.vmem_to_smem (!%p1386_p11), %s148_s28, 16, %s1987_s29, [#allocation4]  }
  0x12   : > { %163 = sbr.rel (!%p2052_p4) target bundleno = 149 (0x95), region = 32  ;;  %s165_s30 = sand.u32 (%p2052_p4), 1, %s1853_s16  }
  0x13   : > { %s1298_s5 = sshll.u32 (%p2052_p4), %s1857_s17, 2  ;;  %s1297_s6 = sshll.u32 (%p2052_p4), %s165_s30, 6 }
  0x14   : > { %s169_s7 = ssub.s32 (%p2052_p4), 5, %s1298_s5  ;;  %s1372_s8 = sshll.u32 (%p2052_p4), %s1857_s17, 5 }
  0x15   : > { %p170_p13 = scmp.lt.s32.totalorder (%p2052_p4), %s169_s7, 4  ;;  %s2083_s11 = scalar_lea.vmem (%p2052_p4), %s2788_s0, %s1372_s8  }
  0x16   : > { %s2087_s14 = scalar_lea.vmem (%p2052_p4), [#allocation2], %s1297_s6  }
  0x17   : > { %s2820_s7 = smov (!%p170_p13, %s169_s7), 4 }
  0x18   : > { %s1299_s12 = sshll.u32 %s2820_s7, 4  ;;  %s2085_s13 = sshll.u32 %s2820_s7, 3 }
  0x19   : > { %p1303_p0 = scmp.eq.s32.totalorder %s1299_s12, 0 }
  0x1a   : > { %p180_p1 = scmp.lt.u32.totalorder (!%p1303_p0), %s2085_s13, 8 }
  0x1b   : > { %179 = sbr.rel (%p1303_p0) target bundleno = 149 (0x95), region = 36 }
  0x20   : > { %183 = sbr.rel (%p180_p1) target bundleno = 139 (0x8b), region = 40  ;;  %s2091_s20 = sand.u32 (!%p180_p1), 7, %s2085_s13  }
  0x21   : > { %p202_p2 = scmp.eq.s32.totalorder (!%p180_p1), %s2091_s20, 0  ;;  %p1304_p3 = scmp.ne.s32.totalorder (!%p180_p1), %s2091_s20, 0 }
  0x25   : > { %205 = sbr.rel (%p1304_p3) target bundleno = 85 (0x55), region = 55  ;;  %s206_s17 = sshrl.u32 (!%p1304_p3), %s2085_s13, 3 }
  0x26   : > { %s2098_s21 = sshrl.u32 (!%p1304_p3), %s206_s17, 4 }
  0x27   : > { %p1305_p4 = scmp.le.s32.totalorder (!%p1304_p3), %s2098_s21, 0 }
  0x2a   : > { %1156 = sbr.rel (%p1305_p4) target bundleno = 68 (0x44), region = 248  ;;  %s2796_s23 = smov (!%p1305_p4), %s2087_s14 }
  0x2b   : > { %s2797_s26 = smov (!%p1305_p4), %s2083_s11  ;;  %s2107_s27 = smov (!%p1305_p4), 0  }
  0x2c   : > { %s2109_s28 = smov (!%p1305_p4), 0  }
  0x2f LB: >> { %v227_v0 = vld [vmem:[%s1865_s26 + $0x28] sm:$0xff]  ;;  %v229_v1 = vld [vmem:[%s1865_s26 + $0x30] sm:$0xff]  ;;  %v231_v2 = vld [vmem:[%s1865_s26 + $0x38] sm:$0xff]  ;;  %s281_s29 = sadd.s32 1, %s1869_s27  ;;  %s211_s28 = sadd.s32 1, %s1873_s28   ;;  %s1873_s28 = sphi %s2109_s28, %s211_s28   ;;  %s1869_s27 = sphi %s2107_s27, %s2800_s27   ;;  %s1865_s26 = sphi %s2797_s26, %s2799_s26   ;;  %s1861_s23 = sphi %s2796_s23, %s2798_s23  }
  0x30   : >> { %250 = vst [vmem:[%s1861_s23 + $0x20] sm:$0xff] %v227_v0  ;;  %v217_v3 = vld [vmem:[%s1865_s26] sm:$0xff]  ;;  %p282_p6 = scmp.ge.s32.totalorder %s281_s29, %s2098_s21  ;;  %v219_v4 = vld [vmem:[%s1865_s26 + $0x8] sm:$0xff]  ;;  %v221_v5 = vld [vmem:[%s1865_s26 + $0x10] sm:$0xff]  ;;  %p210_p7 = scmp.ge.s32.totalorder %s211_s28, %s2098_s21 }
  0x31   : >> { %252 = vst [vmem:[%s1861_s23 + $0x28] sm:$0xff] %v229_v1  ;;  %v223_v6 = vld [vmem:[%s1865_s26 + $0x18] sm:$0xff]  ;;  %v233_v7 = vld [vmem:[%s1865_s26 + $0x40] sm:$0xff]  ;;  %v235_v8 = vld [vmem:[%s1865_s26 + $0x48] sm:$0xff] }
  0x32   : >> { %254 = vst [vmem:[%s1861_s23 + $0x30] sm:$0xff] %v231_v2  ;;  %s2822_s29 = smov (%p282_p6, %s281_s29), 0  ;;  %v237_v9 = vld [vmem:[%s1865_s26 + $0x50] sm:$0xff]  ;;  %v239_v10 = vld [vmem:[%s1865_s26 + $0x58] sm:$0xff]  ;;  %v241_v11 = vld [vmem:[%s1865_s26 + $0x60] sm:$0xff] }
  0x33   : >> { %218 = vst [vmem:[%s1861_s23] sm:$0xff] %v217_v3  ;;  %s1306_s30 = sshll.u32 %s2822_s29, 7  ;;  %v243_v12 = vld [vmem:[%s1865_s26 + $0x68] sm:$0xff]  ;;  %v245_v13 = vld [vmem:[%s1865_s26 + $0x70] sm:$0xff]  ;;  %v247_v14 = vld [vmem:[%s1865_s26 + $0x78] sm:$0xff]  ;;  %s2800_s27 = smov %s2822_s29 }
  0x34   : >> { %220 = vst [vmem:[%s1861_s23 + $0x8] sm:$0xff] %v219_v4  ;;  %s286_s5 = scalar_lea.vmem %s2083_s11, %s1306_s30   ;;  %s287_s6 = scalar_lea.vmem %s2087_s14, %s1306_s30 [#allocation2]   ;;  %v271_v15 = vld [vmem:[%s1865_s26 + $0x80] sm:$0xff]  ;;  %v273_v16 = vld [vmem:[%s1865_s26 + $0x88] sm:$0xff]  ;;  %v275_v17 = vld [vmem:[%s1865_s26 + $0x90] sm:$0xff] }
  0x35   : >> { %222 = vst [vmem:[%s1861_s23 + $0x10] sm:$0xff] %v221_v5  ;;  %v277_v18 = vld [vmem:[%s1865_s26 + $0x98] sm:$0xff]  ;;  %v279_v19 = vld [vmem:[%s1865_s26 + $0xa0] sm:$0xff]  ;;  %s2799_s26 = smov %s286_s5 }
  0x36   : >> { %224 = vst [vmem:[%s1861_s23 + $0x18] sm:$0xff] %v223_v6 }
  0x37   : >> { %256 = vst [vmem:[%s1861_s23 + $0x38] sm:$0xff] %v233_v7 }
  0x38   : >> { %258 = vst [vmem:[%s1861_s23 + $0x40] sm:$0xff] %v235_v8 }
  0x39   : >> { %260 = vst [vmem:[%s1861_s23 + $0x48] sm:$0xff] %v237_v9 }
  0x3a   : >> { %262 = vst [vmem:[%s1861_s23 + $0x50] sm:$0xff] %v239_v10 }
  0x3b   : >> { %264 = vst [vmem:[%s1861_s23 + $0x58] sm:$0xff] %v241_v11 }
  0x3c   : >> { %266 = vst [vmem:[%s1861_s23 + $0x60] sm:$0xff] %v243_v12 }
  0x3d   : >> { %268 = vst [vmem:[%s1861_s23 + $0x68] sm:$0xff] %v245_v13 }
  0x3e   : >> { %270 = vst [vmem:[%s1861_s23 + $0x70] sm:$0xff] %v247_v14 }
  0x3f   : >> { %272 = vst [vmem:[%s1861_s23 + $0x78] sm:$0xff] %v271_v15  ;;  %213 = sbr.rel (!%p210_p7) target bundleno = 47 (0x2f), region = 254 }
  0x40   : >> { %274 = vst [vmem:[%s1861_s23 + $0x80] sm:$0xff] %v273_v16 }
  0x41   : >> { %276 = vst [vmem:[%s1861_s23 + $0x88] sm:$0xff] %v275_v17 }
  0x42   : >> { %278 = vst [vmem:[%s1861_s23 + $0x90] sm:$0xff] %v277_v18 }
  0x43   : >> { %280 = vst [vmem:[%s1861_s23 + $0x98] sm:$0xff] %v279_v19  ;;  %s2798_s23 = smov %s287_s6 }
  0x44 PF: > { %s2180_s7 = sand.u32 15, %s206_s17   ;;  %s1373_s8 = sshll.u32 %s2098_s21, 7 }
  0x45   : > { %s2184_s9 = scalar_lea.vmem %s2083_s11, %s1373_s8   ;;  %s294_s10 = scalar_lea.vmem %s2087_s14, %s1373_s8 [#allocation2]  }
  0x46   : > { %p1311_p10 = scmp.le.s32.totalorder %s2180_s7, 0 }
  0x47   : > { %s1875_s12 = smov (!%p1311_p10), %s294_s10   ;;  %s1879_s29 = smov (!%p1311_p10), %s2184_s9  }
  0x48   : > { %1170 = sbr.rel (%p1311_p10) target bundleno = 85 (0x55), region = 259  ;;  %s1883_s28 = smov (!%p1311_p10), 0  }
  0x49   : > { %s1887_s30 = smov (!%p1311_p10), 0  }
  0x4d LB: >> { %v304_v20 = vld [vmem:[%s1881_s29] sm:$0xff]  ;;  %v306_v21 = vld [vmem:[%s1881_s29 + $0x28] sm:$0xff]  ;;  %s308_s17 = sadd.s32 1, %s1885_s28  ;;  %s298_s30 = sadd.s32 1, %s1889_s30   ;;  %s1889_s30 = sphi %s1887_s30, %s298_s30   ;;  %s1885_s28 = sphi %s1883_s28, %s1884_s28   ;;  %s1881_s29 = sphi %s1879_s29, %s313_s29   ;;  %s1877_s12 = sphi %s1875_s12, %s314_s12  }
  0x4e   : >> { %305 = vst [vmem:[%s1877_s12] sm:$0xff] %v304_v20  ;;  %p309_p11 = scmp.ge.s32.totalorder %s308_s17, %s2180_s7  ;;  %p297_p12 = scmp.ge.s32.totalorder %s298_s30, %s2180_s7 }
  0x4f   : >> { %307 = vst [vmem:[%s1877_s12 + $0x20] sm:$0xff] %v306_v21 }
  0x50   : >> { %s2824_s17 = smov (%p309_p11, %s308_s17), 0  ;;  %300 = sbr.rel (!%p297_p12) target bundleno = 77 (0x4d), region = 265 }
  0x51   : >> { %s1312_s21 = sshll.u32 %s2824_s17, 3  ;;  %s1884_s28 = smov %s2824_s17  }
  0x52   : >> { %s313_s29 = scalar_lea.vmem %s2184_s9, %s1312_s21   ;;  %s314_s12 = scalar_lea.vmem %s294_s10, %s1312_s21 [#allocation2]  }
  0x55 PF: > { %317 = sbr.rel (%p202_p2) target bundleno = 139 (0x8b), region = 73  ;;  %s319_s23 = ssub.s32 (!%p202_p2), %s2085_s13, %s2091_s20 }
  0x56   : > { %s323_s26 = sshrl.u32 (!%p202_p2), %s2085_s13, 3  ;;  %s2198_s27 = scalar_lea.vmem (!%p202_p2), %s2083_s11, %s319_s23 }
  0x57   : > { %s2201_s5 = scalar_lea.vmem (!%p202_p2), %s2087_s14, %s319_s23 [#allocation2]  ;;  %s2205_s6 = sshrl.u32 (!%p202_p2), %s323_s26, 4 }
  0x58   : > { %p1314_p13 = scmp.le.s32.totalorder (!%p202_p2), %s2205_s6, 0 }
  0x5a   : > { %1184 = sbr.rel (%p1314_p13) target bundleno = 116 (0x74), region = 270  ;;  %s2801_s7 = smov (!%p1314_p13), %s2087_s14 }
  0x5b   : > { %s2802_s8 = smov (!%p1314_p13), %s2083_s11  ;;  %s2214_s9 = smov (!%p1314_p13), 0  }
  0x5c   : > { %s2216_s10 = smov (!%p1314_p13), 0  }
  0x5f LB: >> { %v344_v22 = vld [vmem:[%s1897_s8 + $0x28] sm:$0xff]  ;;  %v346_v23 = vld [vmem:[%s1897_s8 + $0x30] sm:$0xff]  ;;  %v348_v24 = vld [vmem:[%s1897_s8 + $0x38] sm:$0xff]  ;;  %s398_s12 = sadd.s32 1, %s1901_s9  ;;  %s328_s10 = sadd.s32 1, %s1905_s10   ;;  %s1905_s10 = sphi %s2216_s10, %s328_s10   ;;  %s1901_s9 = sphi %s2214_s9, %s2805_s9   ;;  %s1897_s8 = sphi %s2802_s8, %s2804_s8   ;;  %s1893_s7 = sphi %s2801_s7, %s2803_s7  }
  0x60   : >> { %367 = vst [vmem:[%s1893_s7 + $0x20] sm:$0xff] %v344_v22  ;;  %v334_v25 = vld [vmem:[%s1897_s8] sm:$0xff]  ;;  %p399_p0 = scmp.ge.s32.totalorder %s398_s12, %s2205_s6  ;;  %v336_v26 = vld [vmem:[%s1897_s8 + $0x8] sm:$0xff]  ;;  %v338_v27 = vld [vmem:[%s1897_s8 + $0x10] sm:$0xff]  ;;  %p327_p1 = scmp.ge.s32.totalorder %s328_s10, %s2205_s6 }
  0x61   : >> { %369 = vst [vmem:[%s1893_s7 + $0x28] sm:$0xff] %v346_v23  ;;  %v340_v28 = vld [vmem:[%s1897_s8 + $0x18] sm:$0xff]  ;;  %v350_v29 = vld [vmem:[%s1897_s8 + $0x40] sm:$0xff]  ;;  %v352_v30 = vld [vmem:[%s1897_s8 + $0x48] sm:$0xff] }
  0x62   : >> { %371 = vst [vmem:[%s1893_s7 + $0x30] sm:$0xff] %v348_v24  ;;  %s2826_s12 = smov (%p399_p0, %s398_s12), 0  ;;  %v354_v31 = vld [vmem:[%s1897_s8 + $0x50] sm:$0xff]  ;;  %v356_v32 = vld [vmem:[%s1897_s8 + $0x58] sm:$0xff]  ;;  %v358_v33 = vld [vmem:[%s1897_s8 + $0x60] sm:$0xff] }
  0x63   : >> { %335 = vst [vmem:[%s1893_s7] sm:$0xff] %v334_v25  ;;  %s1315_s29 = sshll.u32 %s2826_s12, 7  ;;  %v360_v34 = vld [vmem:[%s1897_s8 + $0x68] sm:$0xff]  ;;  %v362_v35 = vld [vmem:[%s1897_s8 + $0x70] sm:$0xff]  ;;  %v364_v36 = vld [vmem:[%s1897_s8 + $0x78] sm:$0xff]  ;;  %s2805_s9 = smov %s2826_s12 }
  0x64   : >> { %337 = vst [vmem:[%s1893_s7 + $0x8] sm:$0xff] %v336_v26  ;;  %s403_s28 = scalar_lea.vmem %s2083_s11, %s1315_s29   ;;  %s404_s30 = scalar_lea.vmem %s2087_s14, %s1315_s29 [#allocation2]   ;;  %v388_v37 = vld [vmem:[%s1897_s8 + $0x80] sm:$0xff]  ;;  %v390_v38 = vld [vmem:[%s1897_s8 + $0x88] sm:$0xff]  ;;  %v392_v39 = vld [vmem:[%s1897_s8 + $0x90] sm:$0xff] }
  0x65   : >> { %339 = vst [vmem:[%s1893_s7 + $0x10] sm:$0xff] %v338_v27  ;;  %v394_v40 = vld [vmem:[%s1897_s8 + $0x98] sm:$0xff]  ;;  %v396_v41 = vld [vmem:[%s1897_s8 + $0xa0] sm:$0xff]  ;;  %s2804_s8 = smov %s403_s28 }
  0x66   : >> { %341 = vst [vmem:[%s1893_s7 + $0x18] sm:$0xff] %v340_v28 }
  0x67   : >> { %373 = vst [vmem:[%s1893_s7 + $0x38] sm:$0xff] %v350_v29 }
  0x68   : >> { %375 = vst [vmem:[%s1893_s7 + $0x40] sm:$0xff] %v352_v30 }
  0x69   : >> { %377 = vst [vmem:[%s1893_s7 + $0x48] sm:$0xff] %v354_v31 }
  0x6a   : >> { %379 = vst [vmem:[%s1893_s7 + $0x50] sm:$0xff] %v356_v32 }
  0x6b   : >> { %381 = vst [vmem:[%s1893_s7 + $0x58] sm:$0xff] %v358_v33 }
  0x6c   : >> { %383 = vst [vmem:[%s1893_s7 + $0x60] sm:$0xff] %v360_v34 }
  0x6d   : >> { %385 = vst [vmem:[%s1893_s7 + $0x68] sm:$0xff] %v362_v35 }
  0x6e   : >> { %387 = vst [vmem:[%s1893_s7 + $0x70] sm:$0xff] %v364_v36 }
  0x6f   : >> { %389 = vst [vmem:[%s1893_s7 + $0x78] sm:$0xff] %v388_v37  ;;  %330 = sbr.rel (!%p327_p1) target bundleno = 95 (0x5f), region = 276 }
  0x70   : >> { %391 = vst [vmem:[%s1893_s7 + $0x80] sm:$0xff] %v390_v38 }
  0x71   : >> { %393 = vst [vmem:[%s1893_s7 + $0x88] sm:$0xff] %v392_v39 }
  0x72   : >> { %395 = vst [vmem:[%s1893_s7 + $0x90] sm:$0xff] %v394_v40 }
  0x73   : >> { %397 = vst [vmem:[%s1893_s7 + $0x98] sm:$0xff] %v396_v41  ;;  %s2803_s7 = smov %s404_s30 }
  0x74 PF: > { %s2287_s17 = sand.u32 15, %s323_s26   ;;  %s1375_s21 = sshll.u32 %s2205_s6, 7 }
  0x75   : > { %s2291_s23 = scalar_lea.vmem %s2083_s11, %s1375_s21   ;;  %s411_s29 = scalar_lea.vmem %s2087_s14, %s1375_s21 [#allocation2]  }
  0x76   : > { %p1320_p2 = scmp.le.s32.totalorder %s2287_s17, 0 }
  0x77   : > { %s1907_s28 = smov (!%p1320_p2), %s411_s29   ;;  %s1911_s12 = smov (!%p1320_p2), %s2291_s23  }
  0x78   : > { %1198 = sbr.rel (%p1320_p2) target bundleno = 133 (0x85), region = 281  ;;  %s1915_s10 = smov (!%p1320_p2), 0  }
  0x79   : > { %s1919_s30 = smov (!%p1320_p2), 0  }
  0x7d LB: >> { %v421_v42 = vld [vmem:[%s1913_s12] sm:$0xff]  ;;  %v423_v43 = vld [vmem:[%s1913_s12 + $0x28] sm:$0xff]  ;;  %s425_s26 = sadd.s32 1, %s1917_s10  ;;  %s415_s30 = sadd.s32 1, %s1921_s30   ;;  %s1921_s30 = sphi %s1919_s30, %s415_s30   ;;  %s1917_s10 = sphi %s1915_s10, %s1916_s10   ;;  %s1913_s12 = sphi %s1911_s12, %s430_s12   ;;  %s1909_s28 = sphi %s1907_s28, %s431_s28  }
  0x7e   : >> { %422 = vst [vmem:[%s1909_s28] sm:$0xff] %v421_v42  ;;  %p426_p3 = scmp.ge.s32.totalorder %s425_s26, %s2287_s17  ;;  %p414_p4 = scmp.ge.s32.totalorder %s415_s30, %s2287_s17 }
  0x7f   : >> { %424 = vst [vmem:[%s1909_s28 + $0x20] sm:$0xff] %v423_v43 }
  0x80   : >> { %s2828_s26 = smov (%p426_p3, %s425_s26), 0  ;;  %417 = sbr.rel (!%p414_p4) target bundleno = 125 (0x7d), region = 287 }
  0x81   : >> { %s1321_s6 = sshll.u32 %s2828_s26, 3  ;;  %s1916_s10 = smov %s2828_s26  }
  0x82   : >> { %s430_s12 = scalar_lea.vmem %s2291_s23, %s1321_s6   ;;  %s431_s28 = scalar_lea.vmem %s411_s29, %s1321_s6 [#allocation2]  }
  0x85 PF: > { %s1988_s7 = smov 1  }
  0x86   : > { %s432_s8 = sshll.u32 %s1988_s7, %s2091_s20 }
  0x87   : > { %s1323_s9 = sadd.s32 4294967295, %s432_s8 }
  0x88   : > { %v442_v44 = vld [vmem:[%s2198_s27] sm:%s1323_s9]  ;;  %v444_v45 = vld [vmem:[%s2198_s27 + $0x28] sm:%s1323_s9] }
  0x89   : > { %443 = vst [vmem:[%s2201_s5] sm:%s1323_s9] %v442_v44 }
  0x8a   : > { %445 = vst [vmem:[%s2201_s5 + $0x20] sm:%s1323_s9] %v444_v45 }
  0x8b PF: > { %p1324_p6 = scmp.ge.u32.totalorder %s2085_s13, 8 }
  0x8c   : > { %s1989_s21 = smov (!%p1324_p6), 1  }
  0x8d   : > { %186 = sbr.rel (%p1324_p6) target bundleno = 149 (0x95), region = 44  ;;  %s187_s17 = sshll.u32 (!%p1324_p6), %s1989_s21, %s2085_s13 }
  0x8e   : > { %s1325_s23 = sadd.s32 (!%p1324_p6), 4294967295, %s187_s17 }
  0x92   : > { %v197_v46 = vld [vmem:[%s2083_s11] sm:%s1325_s23]  ;;  %v199_v47 = vld [vmem:[%s2083_s11 + $0x28] sm:%s1325_s23] }
  0x93   : > { %198 = vst [vmem:[%s2087_s14] sm:%s1325_s23] %v197_v46 }
  0x94   : > { %200 = vst [vmem:[%s2087_s14 + $0x20] sm:%s1325_s23] %v199_v47 }
  0x95 PF: > { %452 = sbr.rel (%p2063_p9) target bundleno = 466 (0x1d2), region = 98  ;;  %s455_s20 = sand.u32 (!%p2063_p9), 1, %s1849_s15  }
  0x96   : > { %s1327_s27 = sshll.u32 (!%p2063_p9), %s455_s20, 6 }
  0x97   : > { %s2315_s5 = scalar_lea.vmem (!%p2063_p9), [#allocation2], %s1327_s27 }
  0x9a   : > { %1844 = dma.done.wait (%p1389_p8), [#allocation4], 16  }
  0x9b   : > { %1846 = vsyncadd (%p1389_p8), [#allocation4], 4294967280 }
  0x9c   : > { %466 = sfence }
  0x9d   : > { %v494_v48 = vld [vmem:[%s2790_s2] sm:$0x1f]  ;;  %v1990_v49 = vmov 2   ;;  %v1991_v50 = vmov 1   ;;  %v1992_v52 = vmov 3   ;;  %v1993_v53 = vmov 0  }
  0x9e   : > { %1682 = vset.pattern.permute.xlu1 %v1990_v49  ;;  %1680 = vset.pattern.permute.xlu0 %v1991_v50  ;;  %v512_v51 = vld [vmem:[%s2791_s3] sm:$0x7]  ;;  %v2328_v54 = vld [vmem:[%s2315_s5 + $0x5] ss:$8 sm:$0xf]  ;;  %s2336_s29 = sld [smem:[#allocation3]]  ;;  %v616_v2 = vlaneseq }
  0x9f   : > { %505 = vperm.xlu1 %1682, %v494_v48   ;;  %501 = vperm.xlu0 %1680, %v494_v48   ;;  %v2331_v56 = vld [vmem:[%s2315_s5 + $0x6] ss:$8 sm:$0xf]  ;;  %v1337_v57 = vld [vmem:[%s2315_s5 + $0x21] ss:$8 sm:$0xf] }
  0xa0   : > { %1684 = vset.pattern.permute.xlu2 %v1991_v50  ;;  %v1342_v58 = vld [vmem:[%s2315_s5 + $0x7] ss:$8 sm:$0xf]  ;;  %v581_v59 = vperm.slane %v2328_v54, 0  ;;  %v582_v60 = vperm.slane %v2328_v54, 1  ;;  %v583_v61 = vperm.slane %v2328_v54, 2 }
  0xa1   : > { %519 = vperm.xlu2 %1684, %v512_v51   ;;  %v584_v62 = vperm.slane %v2328_v54, 3  ;;  %v600_v63 = vperm.slane %v2331_v56, 0  ;;  %s2342_s28 = sld [smem:[#allocation3 + $0x1]]  ;;  %v555_v0 = vperm.slane %v1337_v57, 0  ;;  %v684_v3 = vperm.slane %v1342_v58, 0  ;;  %s1329_s26 = sshll.u32 %s455_s20, 2 }
  0xa2   : > { %v2345_v1 = vld [vmem:[%s2315_s5 + $0x4] ss:$8 sm:$0xf]  ;;  %v685_v4 = vperm.slane %v1342_v58, 1  ;;  %v556_v5 = vperm.slane %v1337_v57, 1  ;;  %v557_v6 = vperm.slane %v1337_v57, 2 }
  0xa3   : > { %v558_v7 = vperm.slane %v1337_v57, 3  ;;  %v686_v8 = vperm.slane %v1342_v58, 2  ;;  %v601_v9 = vperm.slane %v2331_v56, 1  ;;  %v602_v10 = vperm.slane %v2331_v56, 2  ;;  %s2350_s12 = sld [smem:[#allocation3 + $0x2]]  ;;  %s2491_s6 = scalar_lea.vmem [#allocation5], %s1329_s26  }
  0xa4   : > { %v603_v11 = vperm.slane %v2331_v56, 3  ;;  %v687_v12 = vperm.slane %v1342_v58, 3  ;;  %v562_v15 = vperm.slane %v2345_v1, 0  ;;  %v563_v16 = vperm.slane %v2345_v1, 1  ;;  %s2445_s10 = sld [smem:[#allocation3 + $0x3]]  ;;  %s1345_s15 = sshll.u32 (%p2056_p5), %s2037_s18, 2 }
  0xa5   : > { %v564_v17 = vperm.slane %v2345_v1, 2  ;;  %v1341_v18 = vld [vmem:[%s2315_s5 + $0x22] ss:$8 sm:$0xf]  ;;  %v2357_v19 = vshrl.u32 %v616_v2, 7  ;;  %v2359_v20 = vperm.slane %v555_v0, 0  ;;  %v528_v38 = vstv %s2336_s29  ;;  %s2500_s21 = scalar_lea.vmem (%p2056_p5), %s2792_s4, %s1345_s15  }
  0xa6   : > { %v2362_v23 = vld [vmem:[%s2315_s5 + $0x20] ss:$8 sm:$0xf]  ;;  %v2364_v24 = vperm.slane %v556_v5, 0  ;;  %v2366_v25 = vperm.slane %v557_v6, 0  ;;  %v2368_v26 = vperm.slane %v558_v7, 0 }
  0xa7   : > { %1683 = vset.pattern.permute.xlu1 %v1992_v52  ;;  %1681 = vset.pattern.permute.xlu0 %v1993_v53  ;;  %v677_v30 = vperm.slane %v1341_v18, 0  ;;  %v678_v31 = vperm.slane %v1341_v18, 1  ;;  %v679_v32 = vperm.slane %v1341_v18, 2  ;;  %v565_v33 = vperm.slane %v2345_v1, 3  ;;  %s2477_s30 = sld [smem:[#allocation3 + $0x4]]  ;;  %s785_s7 = ssub.s32 (%p2056_p5), 5, %s1345_s15 }
  0xa8   : > { %509 = vperm.xlu1 %1683, %v494_v48   ;;  %497 = vperm.xlu0 %1681, %v494_v48   ;;  %v680_v34 = vperm.slane %v1341_v18, 3  ;;  %v703_v35 = vperm.slane %v2362_v23, 0  ;;  %v704_v36 = vperm.slane %v2362_v23, 1  ;;  %v527_v37 = vld [vmem:[%s2315_s5] ss:$8 sm:$0xf]  ;;  %v534_v40 = vstv %s2342_s28 }
  0xa9   : > { %1685 = vset.pattern.permute.xlu2 %v1993_v53  ;;  %v1331_v39 = vld [vmem:[%s2315_s5 + $0x1] ss:$8 sm:$0xf]  ;;  %vm622_vm0 = vcmp.eq.s32.totalorder %v2357_v19, %v2359_v20  ;;  %vm623_vm1 = vcmp.eq.s32.totalorder %v2357_v19, %v2364_v24  ;;  %vm624_vm2 = vcmp.eq.s32.totalorder %v2357_v19, %v2366_v25  ;;  %vm625_vm3 = vcmp.eq.s32.totalorder %v2357_v19, %v2368_v26  ;;  %p786_p8 = scmp.lt.s32.totalorder (%p2056_p5), %s785_s7, 4 }
  0xaa   : > { %515 = vperm.xlu2 %1685, %v512_v51   ;;  %v705_v44 = vperm.slane %v2362_v23, 2  ;;  %vm630_vm4 = vcmask 1044480   ;;  %v2394_v46 = vperm.slane %v677_v30, 0  ;;  %v2396_v47 = vperm.slane %v678_v31, 0 }
  0xab   : > { %v2398_v48 = vperm.slane %v679_v32, 0  ;;  %v535_v50 = vmul.f32 %v1331_v39, %v534_v40  ;;  %v2401_v52 = vperm.slane %v680_v34, 0  ;;  %v706_v18 = vperm.slane %v2362_v23, 3 }
  0xac   : > { %vm723_vm5 = vcmp.eq.s32.totalorder %v2357_v19, %v2394_v46  ;;  %vm724_vm6 = vcmp.eq.s32.totalorder %v2357_v19, %v2396_v47  ;;  %vm731_vm9 = vcmask 1042432   ;;  %vm666_vm10 = vcmask 1040384  }
  0xad   : > { %vm725_vm7 = vcmp.eq.s32.totalorder %v2357_v19, %v2398_v48  ;;  %vm726_vm8 = vcmp.eq.s32.totalorder %v2357_v19, %v2401_v52  ;;  %vm668_vm11 = vcmask 1042434   ;;  %vm670_vm12 = vcmask 1041408  }
  0xae   : > { %vm774_vm13 = vcmp.lt.s32.totalorder %v616_v2, 512 }
  0xb0   : > { %1686 = vset.pattern.permute.xlu1 %v1990_v49  ;;  %1687 = vset.pattern.permute.xlu0 %v1990_v49  ;;  %v529_v49 = vmul.f32 %v528_v38, %v527_v37 }
  0xb1   : > { %523 = vperm.xlu1 %1686, %v512_v51   ;;  %v540_v51 = vstv %s2350_s12 }
  0xfb   : > { %v520_v55 = vpop.permute.xlu2 %519 }
  0xfc   : > { %v692_v21 = vmul.f32 %v684_v3, %v520_v55  ;;  %v693_v22 = vmul.f32 %v685_v4, %v520_v55  ;;  %v694_v27 = vmul.f32 %v686_v8, %v520_v55  ;;  %v695_v28 = vmul.f32 %v687_v12, %v520_v55 }
 0x104   : > { %v516_v29 = vpop.permute.xlu2 %515 }
 0x105   : > { %v2385_v41 = vadd.f32 %v692_v21, %v516_v29  ;;  %v2387_v42 = vadd.f32 %v693_v22, %v516_v29  ;;  %v2389_v43 = vadd.f32 %v694_v27, %v516_v29  ;;  %v2392_v45 = vadd.f32 %v695_v28, %v516_v29 }
 0x111   : > { %v506_v13 = vpop.permute.xlu1 %505  ;;  %v502_v14 = vpop.permute.xlu0 %501 }
 0x112   : > { %v570_v55 = vmul.f32 %v562_v15, %v502_v14  ;;  %v571_v57 = vmul.f32 %v563_v16, %v502_v14  ;;  %v572_v58 = vmul.f32 %v564_v17, %v502_v14  ;;  %v573_v0 = vmul.f32 %v565_v33, %v502_v14 }
 0x113   : > { %v589_v3 = vmul.f32 %v581_v59, %v506_v13  ;;  %v590_v4 = vmul.f32 %v582_v60, %v506_v13  ;;  %v591_v5 = vmul.f32 %v583_v61, %v506_v13  ;;  %v592_v6 = vmul.f32 %v584_v62, %v506_v13  ;;  %v1333_v13 = vld [vmem:[%s2315_s5 + $0x2] ss:$8 sm:$0xf] }
 0x114   : > { %v2429_v21 = vmul.f32 %v1333_v13, %v540_v51 }
 0x11a   : > { %v510_v53 = vpop.permute.xlu1 %509  ;;  %v498_v1 = vpop.permute.xlu0 %497 }
 0x11b   : > { %v574_v7 = vadd.f32 %v570_v55, %v498_v1  ;;  %v575_v8 = vadd.f32 %v571_v57, %v498_v1  ;;  %v576_v12 = vadd.f32 %v572_v58, %v498_v1  ;;  %v577_v15 = vadd.f32 %v573_v0, %v498_v1 }
 0x11c   : > { %v608_v14 = vmul.f32 %v600_v63, %v510_v53  ;;  %v609_v59 = vmul.f32 %v601_v9, %v510_v53  ;;  %v610_v16 = vmul.f32 %v602_v10, %v510_v53  ;;  %v611_v60 = vmul.f32 %v603_v11, %v510_v53 }
 0x11d   : > { %v593_v61 = vadd.f32 %v589_v3, %v574_v7  ;;  %v594_v17 = vadd.f32 %v590_v4, %v575_v8  ;;  %v595_v54 = vadd.f32 %v591_v5, %v576_v12  ;;  %v596_v62 = vadd.f32 %v592_v6, %v577_v15 }
 0x11e   : > { %v2427_v11 = vadd.f32 %v535_v50, %v529_v49  ;;  %v546_v5 = vstv %s2445_s10 }
 0x11f   : > { %v612_v63 = vadd.f32 %v608_v14, %v593_v61  ;;  %v613_v9 = vadd.f32 %v609_v59, %v594_v17  ;;  %v614_v56 = vadd.f32 %v610_v16, %v595_v54  ;;  %v615_v10 = vadd.f32 %v611_v60, %v596_v62  ;;  %v1335_v14 = vld [vmem:[%s2315_s5 + $0x3] ss:$8 sm:$0xf] }
 0x121   : > { %v626_v22 = vsel %vm622_vm0, %v612_v63, 0.0  ;;  %v627_v27 = vsel %vm623_vm1, %v613_v9, 0.0  ;;  %v628_v28 = vsel %vm624_vm2, %v614_v56, 0.0  ;;  %v629_v29 = vsel %vm625_vm3, %v615_v10, 0.0 }
 0x122   : > { %v631_v30 = vsel %vm630_vm4, %v626_v22, 0.0  ;;  %v638_v31 = vsel %vm630_vm4, %v627_v27, 0.0  ;;  %v645_v20 = vsel %vm630_vm4, %v628_v28, 0.0  ;;  %v652_v32 = vsel %vm630_vm4, %v629_v29, 0.0 }
 0x123   : > { %v524_v24 = vpop.permute.xlu1 %523  ;;  %v632_v33 = vrot.slane %v631_v30, 4  ;;  %v639_v34 = vrot.slane %v638_v31, 4  ;;  %v646_v37 = vrot.slane %v645_v20, 4  ;;  %v653_v25 = vrot.slane %v652_v32, 4 }
 0x124   : > { %v711_v38 = vmul.f32 %v703_v35, %v524_v24  ;;  %v712_v26 = vmul.f32 %v704_v36, %v524_v24  ;;  %v713_v39 = vmul.f32 %v705_v44, %v524_v24  ;;  %v714_v40 = vmul.f32 %v706_v18, %v524_v24 }
 0x125   : > { %v633_v49 = vadd.f32 %v632_v33, %v631_v30  ;;  %v640_v50 = vadd.f32 %v639_v34, %v638_v31  ;;  %v647_v51 = vadd.f32 %v646_v37, %v645_v20  ;;  %v654_v53 = vadd.f32 %v653_v25, %v652_v32 }
 0x126   : > { %v715_v55 = vadd.f32 %v711_v38, %v2385_v41  ;;  %v716_v57 = vadd.f32 %v712_v26, %v2387_v42  ;;  %v717_v58 = vadd.f32 %v713_v39, %v2389_v43  ;;  %v718_v0 = vadd.f32 %v714_v40, %v2392_v45 }
 0x127   : > { %v634_v1 = vrot.slane %v633_v49, 2  ;;  %v641_v35 = vrot.slane %v640_v50, 2  ;;  %v648_v3 = vrot.slane %v647_v51, 2  ;;  %v655_v23 = vrot.slane %v654_v53, 2 }
 0x128   : > { %v727_v36 = vsel %vm723_vm5, %v715_v55, 0.0  ;;  %v728_v44 = vsel %vm724_vm6, %v716_v57, 0.0  ;;  %v729_v41 = vsel %vm725_vm7, %v717_v58, 0.0  ;;  %v730_v42 = vsel %vm726_vm8, %v718_v0, 0.0 }
 0x129   : > { %v642_v43 = vadd.f32 %v641_v35, %v640_v50  ;;  %v649_v45 = vadd.f32 %v648_v3, %v647_v51  ;;  %v656_v4 = vadd.f32 %v655_v23, %v654_v53  ;;  %v732_v46 = vsel %vm731_vm9, %v727_v36, 0.0 }
 0x12a   : > { %v739_v6 = vsel %vm731_vm9, %v728_v44, 0.0  ;;  %v746_v47 = vsel %vm731_vm9, %v729_v41, 0.0  ;;  %v753_v7 = vsel %vm731_vm9, %v730_v42, 0.0  ;;  %v635_v8 = vadd.f32 %v634_v1, %v633_v49 }
 0x12b   : > { %v643_v12 = vrot.slane %v642_v43, 1  ;;  %v650_v48 = vrot.slane %v649_v45, 1  ;;  %v657_v15 = vrot.slane %v656_v4, 1  ;;  %v733_v19 = vrot.slane %v732_v46, 4 }
 0x12c   : > { %v740_v52 = vrot.slane %v739_v6, 4  ;;  %v747_v59 = vrot.slane %v746_v47, 4  ;;  %v754_v16 = vrot.slane %v753_v7, 4  ;;  %v636_v63 = vrot.slane %v635_v8, 1 }
 0x12d   : > { %v644_v60 = vadd.f32 %v643_v12, %v642_v43  ;;  %v651_v61 = vadd.f32 %v650_v48, %v649_v45  ;;  %v658_v17 = vadd.f32 %v657_v15, %v656_v4  ;;  %v734_v54 = vadd.f32 %v733_v19, %v732_v46 }
 0x12e   : > { %v741_v62 = vadd.f32 %v740_v52, %v739_v6  ;;  %v748_v13 = vadd.f32 %v747_v59, %v746_v47  ;;  %v755_v18 = vadd.f32 %v754_v16, %v753_v7  ;;  %v542_v9 = vadd.f32 %v2429_v21, %v2427_v11 }
 0x12f   : > { %v547_v56 = vmul.f32 %v1335_v14, %v546_v5  ;;  %v735_v10 = vrot.slane %v734_v54, 2  ;;  %v663_v29 = vrot.slane %v644_v60, 7  ;;  %v664_v30 = vrot.slane %v651_v61, 6 }
 0x130   : > { %v742_v22 = vrot.slane %v741_v62, 2  ;;  %v749_v27 = vrot.slane %v748_v13, 2  ;;  %v756_v28 = vrot.slane %v755_v18, 2  ;;  %v665_v31 = vrot.slane %v658_v17, 5 }
 0x131   : > { %v736_v20 = vadd.f32 %v735_v10, %v734_v54  ;;  %v637_v33 = vadd.f32 %v636_v63, %v635_v8  ;;  %v548_v34 = vadd.f32 %v547_v56, %v542_v9  ;;  %v550_v25 = vstv %s2477_s30 }
 0x132   : > { %v743_v32 = vadd.f32 %v742_v22, %v741_v62  ;;  %v750_v24 = vadd.f32 %v749_v27, %v748_v13  ;;  %v757_v37 = vadd.f32 %v756_v28, %v755_v18  ;;  %v669_v39 = vsel %vm668_vm11, %v664_v30, %v665_v31 }
 0x133   : > { %v737_v11 = vrot.slane %v736_v20, 1  ;;  %v667_v26 = vsel %vm666_vm10, %v637_v33, %v663_v29  ;;  %v551_v51 = vadd.f32 %v550_v25, %v548_v34 }
 0x134   : > { %v744_v21 = vrot.slane %v743_v32, 1  ;;  %v751_v38 = vrot.slane %v750_v24, 1  ;;  %v758_v40 = vrot.slane %v757_v37, 1  ;;  %v671_v55 = vsel %vm670_vm12, %v667_v26, %v669_v39 }
 0x135   : > { %v738_v57 = vadd.f32 %v737_v11, %v736_v20  ;;  %v673_v3 = vadd.f32 %v671_v55, %v551_v51 }
 0x136   : > { %v745_v49 = vadd.f32 %v744_v21, %v743_v32  ;;  %v752_v50 = vadd.f32 %v751_v38, %v750_v24  ;;  %v759_v53 = vadd.f32 %v758_v40, %v757_v37 }
 0x138   : > { %v764_v58 = vrot.slane %v745_v49, 7  ;;  %v765_v0 = vrot.slane %v752_v50, 6  ;;  %v766_v1 = vrot.slane %v759_v53, 5 }
 0x13a   : > { %v767_v35 = vsel %vm666_vm10, %v738_v57, %v764_v58  ;;  %v768_v23 = vsel %vm668_vm11, %v765_v0, %v766_v1  ;;  %783 = sbr.rel (!%p2056_p5) target bundleno = 466 (0x1d2), region = 110 }
 0x13b   : > { %v769_v36 = vsel %vm670_vm12, %v767_v35, %v768_v23 }
 0x13c   : > { %v771_v44 = vadd.f32 %v769_v36, %v673_v3 }
 0x13e   : > { %776 = vst.msk [vmem:[%s2491_s6] sm:$0xf] %vm774_vm13, %v771_v44 }
 0x13f   : > { %s2830_s7 = smov (!%p786_p8, %s785_s7), 4 }
 0x140   : > { %p1347_p9 = scmp.eq.s32.totalorder %s2830_s7, 0 }
 0x141   : > { %p793_p7 = scmp.lt.u32.totalorder (!%p1347_p9), %s2830_s7, 8 }
 0x142   : > { %792 = sbr.rel (%p1347_p9) target bundleno = 466 (0x1d2), region = 114 }
 0x147   : > { %796 = sbr.rel (%p793_p7) target bundleno = 457 (0x1c9), region = 118  ;;  %s2507_s24 = sand.u32 (!%p793_p7), 7, %s2830_s7  }
 0x148   : > { %p813_p5 = scmp.eq.s32.totalorder (!%p793_p7), %s2507_s24, 0  ;;  %p1348_p10 = scmp.ne.s32.totalorder (!%p793_p7), %s2507_s24, 0 }
 0x14c   : > { %816 = sbr.rel (%p1348_p10) target bundleno = 392 (0x188), region = 133  ;;  %s817_s18 = sshrl.u32 (!%p1348_p10), %s2830_s7, 3 }
 0x14d   : > { %s2514_s17 = sshrl.u32 (!%p1348_p10), %s817_s18, 5 }
 0x14e   : > { %p1349_p11 = scmp.le.s32.totalorder (!%p1348_p10), %s2514_s17, 0 }
 0x151   : > { %1212 = sbr.rel (%p1349_p11) target bundleno = 375 (0x177), region = 292  ;;  %s2806_s23 = smov (!%p1349_p11), %s2500_s21 }
 0x152   : > { %s2807_s20 = smov (!%p1349_p11), %s2491_s6  ;;  %s2523_s27 = smov (!%p1349_p11), 0  }
 0x153   : > { %s2525_s5 = smov (!%p1349_p11), 0  }
 0x156 LB: >> { %v828_v2 = vld [vmem:[%s1929_s20] sm:$0xff]  ;;  %v830_v41 = vld [vmem:[%s1929_s20 + $0x8] sm:$0xff]  ;;  %v832_v42 = vld [vmem:[%s1929_s20 + $0x10] sm:$0xff]  ;;  %s892_s11 = sadd.s32 1, %s1933_s27  ;;  %s822_s5 = sadd.s32 1, %s1937_s5   ;;  %s1937_s5 = sphi %s2525_s5, %s822_s5   ;;  %s1933_s27 = sphi %s2523_s27, %s2810_s27   ;;  %s1929_s20 = sphi %s2807_s20, %s2809_s20   ;;  %s1925_s23 = sphi %s2806_s23, %s2808_s23  }
 0x157   : >> { %829 = vst [vmem:[%s1925_s23] sm:$0xff] %v828_v2  ;;  %v834_v43 = vld [vmem:[%s1929_s20 + $0x18] sm:$0xff]  ;;  %p893_p12 = scmp.ge.s32.totalorder %s892_s11, %s2514_s17  ;;  %v836_v45 = vld [vmem:[%s1929_s20 + $0x20] sm:$0xff]  ;;  %v838_v4 = vld [vmem:[%s1929_s20 + $0x28] sm:$0xff]  ;;  %p821_p13 = scmp.ge.s32.totalorder %s822_s5, %s2514_s17 }
 0x158   : >> { %831 = vst [vmem:[%s1925_s23 + $0x8] sm:$0xff] %v830_v41  ;;  %v840_v5 = vld [vmem:[%s1929_s20 + $0x30] sm:$0xff]  ;;  %v842_v46 = vld [vmem:[%s1929_s20 + $0x38] sm:$0xff]  ;;  %v844_v6 = vld [vmem:[%s1929_s20 + $0x40] sm:$0xff] }
 0x159   : >> { %833 = vst [vmem:[%s1925_s23 + $0x10] sm:$0xff] %v832_v42  ;;  %s2832_s11 = smov (%p893_p12, %s892_s11), 0  ;;  %v846_v47 = vld [vmem:[%s1929_s20 + $0x48] sm:$0xff]  ;;  %v848_v7 = vld [vmem:[%s1929_s20 + $0x50] sm:$0xff]  ;;  %v850_v8 = vld [vmem:[%s1929_s20 + $0x58] sm:$0xff] }
 0x15a   : >> { %835 = vst [vmem:[%s1925_s23 + $0x18] sm:$0xff] %v834_v43  ;;  %s1350_s13 = sshll.u32 %s2832_s11, 8  ;;  %v852_v12 = vld [vmem:[%s1929_s20 + $0x60] sm:$0xff]  ;;  %v854_v48 = vld [vmem:[%s1929_s20 + $0x68] sm:$0xff]  ;;  %v856_v15 = vld [vmem:[%s1929_s20 + $0x70] sm:$0xff]  ;;  %s2810_s27 = smov %s2832_s11 }
 0x15b   : >> { %837 = vst [vmem:[%s1925_s23 + $0x20] sm:$0xff] %v836_v45  ;;  %s2557_s25 = scalar_lea.vmem %s2491_s6, %s1350_s13 [#allocation5]   ;;  %s2560_s14 = scalar_lea.vmem %s2500_s21, %s1350_s13   ;;  %v858_v14 = vld [vmem:[%s1929_s20 + $0x78] sm:$0xff]  ;;  %v860_v19 = vld [vmem:[%s1929_s20 + $0x80] sm:$0xff]  ;;  %v862_v52 = vld [vmem:[%s1929_s20 + $0x88] sm:$0xff] }
 0x15c   : >> { %839 = vst [vmem:[%s1925_s23 + $0x28] sm:$0xff] %v838_v4  ;;  %v864_v59 = vld [vmem:[%s1929_s20 + $0x90] sm:$0xff]  ;;  %v866_v16 = vld [vmem:[%s1929_s20 + $0x98] sm:$0xff]  ;;  %v868_v60 = vld [vmem:[%s1929_s20 + $0xa0] sm:$0xff] }
 0x15d   : >> { %841 = vst [vmem:[%s1925_s23 + $0x30] sm:$0xff] %v840_v5  ;;  %v870_v61 = vld [vmem:[%s1929_s20 + $0xa8] sm:$0xff]  ;;  %v872_v17 = vld [vmem:[%s1929_s20 + $0xb0] sm:$0xff]  ;;  %v874_v54 = vld [vmem:[%s1929_s20 + $0xb8] sm:$0xff] }
 0x15e   : >> { %843 = vst [vmem:[%s1925_s23 + $0x38] sm:$0xff] %v842_v46  ;;  %v876_v62 = vld [vmem:[%s1929_s20 + $0xc0] sm:$0xff]  ;;  %v878_v13 = vld [vmem:[%s1929_s20 + $0xc8] sm:$0xff]  ;;  %v880_v18 = vld [vmem:[%s1929_s20 + $0xd0] sm:$0xff] }
 0x15f   : >> { %845 = vst [vmem:[%s1925_s23 + $0x40] sm:$0xff] %v844_v6  ;;  %v882_v63 = vld [vmem:[%s1929_s20 + $0xd8] sm:$0xff]  ;;  %v884_v9 = vld [vmem:[%s1929_s20 + $0xe0] sm:$0xff]  ;;  %v886_v56 = vld [vmem:[%s1929_s20 + $0xe8] sm:$0xff] }
 0x160   : >> { %847 = vst [vmem:[%s1925_s23 + $0x48] sm:$0xff] %v846_v47  ;;  %v888_v10 = vld [vmem:[%s1929_s20 + $0xf0] sm:$0xff]  ;;  %v890_v22 = vld [vmem:[%s1929_s20 + $0xf8] sm:$0xff]  ;;  %s2809_s20 = smov %s2557_s25 }
 0x161   : >> { %849 = vst [vmem:[%s1925_s23 + $0x50] sm:$0xff] %v848_v7 }
 0x162   : >> { %851 = vst [vmem:[%s1925_s23 + $0x58] sm:$0xff] %v850_v8 }
 0x163   : >> { %853 = vst [vmem:[%s1925_s23 + $0x60] sm:$0xff] %v852_v12 }
 0x164   : >> { %855 = vst [vmem:[%s1925_s23 + $0x68] sm:$0xff] %v854_v48 }
 0x165   : >> { %857 = vst [vmem:[%s1925_s23 + $0x70] sm:$0xff] %v856_v15 }
 0x166   : >> { %859 = vst [vmem:[%s1925_s23 + $0x78] sm:$0xff] %v858_v14 }
 0x167   : >> { %861 = vst [vmem:[%s1925_s23 + $0x80] sm:$0xff] %v860_v19 }
 0x168   : >> { %863 = vst [vmem:[%s1925_s23 + $0x88] sm:$0xff] %v862_v52 }
 0x169   : >> { %865 = vst [vmem:[%s1925_s23 + $0x90] sm:$0xff] %v864_v59 }
 0x16a   : >> { %867 = vst [vmem:[%s1925_s23 + $0x98] sm:$0xff] %v866_v16 }
 0x16b   : >> { %869 = vst [vmem:[%s1925_s23 + $0xa0] sm:$0xff] %v868_v60 }
 0x16c   : >> { %871 = vst [vmem:[%s1925_s23 + $0xa8] sm:$0xff] %v870_v61 }
 0x16d   : >> { %873 = vst [vmem:[%s1925_s23 + $0xb0] sm:$0xff] %v872_v17 }
 0x16e   : >> { %875 = vst [vmem:[%s1925_s23 + $0xb8] sm:$0xff] %v874_v54 }
 0x16f   : >> { %877 = vst [vmem:[%s1925_s23 + $0xc0] sm:$0xff] %v876_v62 }
 0x170   : >> { %879 = vst [vmem:[%s1925_s23 + $0xc8] sm:$0xff] %v878_v13 }
 0x171   : >> { %881 = vst [vmem:[%s1925_s23 + $0xd0] sm:$0xff] %v880_v18 }
 0x172   : >> { %883 = vst [vmem:[%s1925_s23 + $0xd8] sm:$0xff] %v882_v63  ;;  %824 = sbr.rel (!%p821_p13) target bundleno = 342 (0x156), region = 298 }
 0x173   : >> { %885 = vst [vmem:[%s1925_s23 + $0xe0] sm:$0xff] %v884_v9 }
 0x174   : >> { %887 = vst [vmem:[%s1925_s23 + $0xe8] sm:$0xff] %v886_v56 }
 0x175   : >> { %889 = vst [vmem:[%s1925_s23 + $0xf0] sm:$0xff] %v888_v10 }
 0x176   : >> { %891 = vst [vmem:[%s1925_s23 + $0xf8] sm:$0xff] %v890_v22  ;;  %s2808_s23 = smov %s2560_s14 }
 0x177 PF: > { %s2626_s29 = sand.u32 31, %s817_s18   ;;  %s1377_s28 = sshll.u32 %s2514_s17, 8 }
 0x178   : > { %s903_s12 = scalar_lea.vmem %s2491_s6, %s1377_s28 [#allocation5]   ;;  %s905_s10 = scalar_lea.vmem %s2500_s21, %s1377_s28  }
 0x179   : > { %p1355_p0 = scmp.le.s32.totalorder %s2626_s29, 0 }
 0x17a   : > { %s1939_s30 = smov (!%p1355_p0), %s905_s10   ;;  %s1943_s26 = smov (!%p1355_p0), %s903_s12  }
 0x17b   : > { %1226 = sbr.rel (%p1355_p0) target bundleno = 392 (0x188), region = 303  ;;  %s1947_s15 = smov (!%p1355_p0), 0  }
 0x17c   : > { %s1951_s8 = smov (!%p1355_p0), 0  }
 0x180 LB: >> { %v915_v27 = vld [vmem:[%s1945_s26] sm:$0xff]  ;;  %s917_s9 = sadd.s32 1, %s1949_s15  ;;  %s909_s8 = sadd.s32 1, %s1953_s8   ;;  %s1953_s8 = sphi %s1951_s8, %s909_s8   ;;  %s1949_s15 = sphi %s1947_s15, %s1948_s15   ;;  %s1945_s26 = sphi %s1943_s26, %s922_s26   ;;  %s1941_s30 = sphi %s1939_s30, %s923_s30  }
 0x181   : >> { %916 = vst [vmem:[%s1941_s30] sm:$0xff] %v915_v27  ;;  %p918_p1 = scmp.ge.s32.totalorder %s917_s9, %s2626_s29  ;;  %p908_p2 = scmp.ge.s32.totalorder %s909_s8, %s2626_s29 }
 0x183   : >> { %s2834_s9 = smov (%p918_p1, %s917_s9), 0  ;;  %911 = sbr.rel (!%p908_p2) target bundleno = 384 (0x180), region = 309 }
 0x184   : >> { %s1356_s18 = sshll.u32 %s2834_s9, 3  ;;  %s1948_s15 = smov %s2834_s9  }
 0x185   : >> { %s922_s26 = scalar_lea.vmem %s903_s12, %s1356_s18 [#allocation5]   ;;  %s923_s30 = scalar_lea.vmem %s905_s10, %s1356_s18  }
 0x188 PF: > { %926 = sbr.rel (%p813_p5) target bundleno = 457 (0x1c9), region = 151  ;;  %s2638_s17 = ssub.s32 (!%p813_p5), %s2830_s7, %s2507_s24 }
 0x189   : > { %s932_s23 = sshrl.u32 (!%p813_p5), %s2830_s7, 3  ;;  %s929_s20 = scalar_lea.vmem (!%p813_p5), %s2491_s6, %s2638_s17 [#allocation5] }
 0x18a   : > { %s931_s27 = scalar_lea.vmem (!%p813_p5), %s2500_s21, %s2638_s17  ;;  %s2647_s5 = sshrl.u32 (!%p813_p5), %s932_s23, 5 }
 0x18b   : > { %p1358_p3 = scmp.le.s32.totalorder (!%p813_p5), %s2647_s5, 0 }
 0x18d   : > { %1240 = sbr.rel (%p1358_p3) target bundleno = 435 (0x1b3), region = 314  ;;  %s2811_s11 = smov (!%p1358_p3), %s2500_s21 }
 0x18e   : > { %s2812_s13 = smov (!%p1358_p3), %s2491_s6  ;;  %s2656_s25 = smov (!%p1358_p3), 0  }
 0x18f   : > { %s2658_s14 = smov (!%p1358_p3), 0  }
 0x192 LB: >> { %v943_v28 = vld [vmem:[%s1961_s13] sm:$0xff]  ;;  %v945_v29 = vld [vmem:[%s1961_s13 + $0x8] sm:$0xff]  ;;  %v947_v30 = vld [vmem:[%s1961_s13 + $0x10] sm:$0xff]  ;;  %s1007_s29 = sadd.s32 1, %s1965_s25  ;;  %s937_s14 = sadd.s32 1, %s1969_s14   ;;  %s1969_s14 = sphi %s2658_s14, %s937_s14   ;;  %s1965_s25 = sphi %s2656_s25, %s2815_s25   ;;  %s1961_s13 = sphi %s2812_s13, %s2814_s13   ;;  %s1957_s11 = sphi %s2811_s11, %s2813_s11  }
 0x193   : >> { %944 = vst [vmem:[%s1957_s11] sm:$0xff] %v943_v28  ;;  %v949_v31 = vld [vmem:[%s1961_s13 + $0x18] sm:$0xff]  ;;  %p1008_p4 = scmp.ge.s32.totalorder %s1007_s29, %s2647_s5  ;;  %v951_v20 = vld [vmem:[%s1961_s13 + $0x20] sm:$0xff]  ;;  %v953_v32 = vld [vmem:[%s1961_s13 + $0x28] sm:$0xff]  ;;  %p936_p6 = scmp.ge.s32.totalorder %s937_s14, %s2647_s5 }
 0x194   : >> { %946 = vst [vmem:[%s1957_s11 + $0x8] sm:$0xff] %v945_v29  ;;  %v955_v24 = vld [vmem:[%s1961_s13 + $0x30] sm:$0xff]  ;;  %v957_v33 = vld [vmem:[%s1961_s13 + $0x38] sm:$0xff]  ;;  %v959_v34 = vld [vmem:[%s1961_s13 + $0x40] sm:$0xff] }
 0x195   : >> { %948 = vst [vmem:[%s1957_s11 + $0x10] sm:$0xff] %v947_v30  ;;  %s2836_s29 = smov (%p1008_p4, %s1007_s29), 0  ;;  %v961_v37 = vld [vmem:[%s1961_s13 + $0x48] sm:$0xff]  ;;  %v963_v25 = vld [vmem:[%s1961_s13 + $0x50] sm:$0xff]  ;;  %v965_v11 = vld [vmem:[%s1961_s13 + $0x58] sm:$0xff] }
 0x196   : >> { %950 = vst [vmem:[%s1957_s11 + $0x18] sm:$0xff] %v949_v31  ;;  %s1359_s28 = sshll.u32 %s2836_s29, 8  ;;  %v967_v21 = vld [vmem:[%s1961_s13 + $0x60] sm:$0xff]  ;;  %v969_v38 = vld [vmem:[%s1961_s13 + $0x68] sm:$0xff]  ;;  %v971_v26 = vld [vmem:[%s1961_s13 + $0x70] sm:$0xff]  ;;  %s2815_s25 = smov %s2836_s29 }
 0x197   : >> { %952 = vst [vmem:[%s1957_s11 + $0x20] sm:$0xff] %v951_v20  ;;  %s2690_s12 = scalar_lea.vmem %s2491_s6, %s1359_s28 [#allocation5]   ;;  %s2693_s10 = scalar_lea.vmem %s2500_s21, %s1359_s28   ;;  %v973_v39 = vld [vmem:[%s1961_s13 + $0x78] sm:$0xff]  ;;  %v975_v40 = vld [vmem:[%s1961_s13 + $0x80] sm:$0xff]  ;;  %v977_v49 = vld [vmem:[%s1961_s13 + $0x88] sm:$0xff] }
 0x198   : >> { %954 = vst [vmem:[%s1957_s11 + $0x28] sm:$0xff] %v953_v32  ;;  %v979_v50 = vld [vmem:[%s1961_s13 + $0x90] sm:$0xff]  ;;  %v981_v51 = vld [vmem:[%s1961_s13 + $0x98] sm:$0xff]  ;;  %v983_v53 = vld [vmem:[%s1961_s13 + $0xa0] sm:$0xff] }
 0x199   : >> { %956 = vst [vmem:[%s1957_s11 + $0x30] sm:$0xff] %v955_v24  ;;  %v985_v55 = vld [vmem:[%s1961_s13 + $0xa8] sm:$0xff]  ;;  %v987_v57 = vld [vmem:[%s1961_s13 + $0xb0] sm:$0xff]  ;;  %v989_v58 = vld [vmem:[%s1961_s13 + $0xb8] sm:$0xff] }
 0x19a   : >> { %958 = vst [vmem:[%s1957_s11 + $0x38] sm:$0xff] %v957_v33  ;;  %v991_v0 = vld [vmem:[%s1961_s13 + $0xc0] sm:$0xff]  ;;  %v993_v1 = vld [vmem:[%s1961_s13 + $0xc8] sm:$0xff]  ;;  %v995_v35 = vld [vmem:[%s1961_s13 + $0xd0] sm:$0xff] }
 0x19b   : >> { %960 = vst [vmem:[%s1957_s11 + $0x40] sm:$0xff] %v959_v34  ;;  %v997_v3 = vld [vmem:[%s1961_s13 + $0xd8] sm:$0xff]  ;;  %v999_v23 = vld [vmem:[%s1961_s13 + $0xe0] sm:$0xff]  ;;  %v1001_v36 = vld [vmem:[%s1961_s13 + $0xe8] sm:$0xff] }
 0x19c   : >> { %962 = vst [vmem:[%s1957_s11 + $0x48] sm:$0xff] %v961_v37  ;;  %v1003_v44 = vld [vmem:[%s1961_s13 + $0xf0] sm:$0xff]  ;;  %v1005_v2 = vld [vmem:[%s1961_s13 + $0xf8] sm:$0xff]  ;;  %s2814_s13 = smov %s2690_s12 }
 0x19d   : >> { %964 = vst [vmem:[%s1957_s11 + $0x50] sm:$0xff] %v963_v25 }
 0x19e   : >> { %966 = vst [vmem:[%s1957_s11 + $0x58] sm:$0xff] %v965_v11 }
 0x19f   : >> { %968 = vst [vmem:[%s1957_s11 + $0x60] sm:$0xff] %v967_v21 }
 0x1a0   : >> { %970 = vst [vmem:[%s1957_s11 + $0x68] sm:$0xff] %v969_v38 }
 0x1a1   : >> { %972 = vst [vmem:[%s1957_s11 + $0x70] sm:$0xff] %v971_v26 }
 0x1a2   : >> { %974 = vst [vmem:[%s1957_s11 + $0x78] sm:$0xff] %v973_v39 }
 0x1a3   : >> { %976 = vst [vmem:[%s1957_s11 + $0x80] sm:$0xff] %v975_v40 }
 0x1a4   : >> { %978 = vst [vmem:[%s1957_s11 + $0x88] sm:$0xff] %v977_v49 }
 0x1a5   : >> { %980 = vst [vmem:[%s1957_s11 + $0x90] sm:$0xff] %v979_v50 }
 0x1a6   : >> { %982 = vst [vmem:[%s1957_s11 + $0x98] sm:$0xff] %v981_v51 }
 0x1a7   : >> { %984 = vst [vmem:[%s1957_s11 + $0xa0] sm:$0xff] %v983_v53 }
 0x1a8   : >> { %986 = vst [vmem:[%s1957_s11 + $0xa8] sm:$0xff] %v985_v55 }
 0x1a9   : >> { %988 = vst [vmem:[%s1957_s11 + $0xb0] sm:$0xff] %v987_v57 }
 0x1aa   : >> { %990 = vst [vmem:[%s1957_s11 + $0xb8] sm:$0xff] %v989_v58 }
 0x1ab   : >> { %992 = vst [vmem:[%s1957_s11 + $0xc0] sm:$0xff] %v991_v0 }
 0x1ac   : >> { %994 = vst [vmem:[%s1957_s11 + $0xc8] sm:$0xff] %v993_v1 }
 0x1ad   : >> { %996 = vst [vmem:[%s1957_s11 + $0xd0] sm:$0xff] %v995_v35 }
 0x1ae   : >> { %998 = vst [vmem:[%s1957_s11 + $0xd8] sm:$0xff] %v997_v3  ;;  %939 = sbr.rel (!%p936_p6) target bundleno = 402 (0x192), region = 320 }
 0x1af   : >> { %1000 = vst [vmem:[%s1957_s11 + $0xe0] sm:$0xff] %v999_v23 }
 0x1b0   : >> { %1002 = vst [vmem:[%s1957_s11 + $0xe8] sm:$0xff] %v1001_v36 }
 0x1b1   : >> { %1004 = vst [vmem:[%s1957_s11 + $0xf0] sm:$0xff] %v1003_v44 }
 0x1b2   : >> { %1006 = vst [vmem:[%s1957_s11 + $0xf8] sm:$0xff] %v1005_v2  ;;  %s2813_s11 = smov %s2693_s10 }
 0x1b3 PF: > { %s2759_s30 = sand.u32 31, %s932_s23   ;;  %s1379_s26 = sshll.u32 %s2647_s5, 8 }
 0x1b4   : > { %s1018_s15 = scalar_lea.vmem %s2491_s6, %s1379_s26 [#allocation5]   ;;  %s1020_s8 = scalar_lea.vmem %s2500_s21, %s1379_s26  }
 0x1b5   : > { %p1364_p8 = scmp.le.s32.totalorder %s2759_s30, 0 }
 0x1b6   : > { %s1971_s9 = smov (!%p1364_p8), %s1020_s8   ;;  %s1975_s18 = smov (!%p1364_p8), %s1018_s15  }
 0x1b7   : > { %1254 = sbr.rel (%p1364_p8) target bundleno = 452 (0x1c4), region = 325  ;;  %s1979_s29 = smov (!%p1364_p8), 0  }
 0x1b8   : > { %s1983_s28 = smov (!%p1364_p8), 0  }
 0x1bc LB: >> { %v1030_v41 = vld [vmem:[%s1977_s18] sm:$0xff]  ;;  %s1032_s23 = sadd.s32 1, %s1981_s29  ;;  %s1024_s28 = sadd.s32 1, %s1985_s28   ;;  %s1985_s28 = sphi %s1983_s28, %s1024_s28   ;;  %s1981_s29 = sphi %s1979_s29, %s1980_s29   ;;  %s1977_s18 = sphi %s1975_s18, %s1037_s18   ;;  %s1973_s9 = sphi %s1971_s9, %s1038_s9  }
 0x1bd   : >> { %1031 = vst [vmem:[%s1973_s9] sm:$0xff] %v1030_v41  ;;  %p1033_p9 = scmp.ge.s32.totalorder %s1032_s23, %s2759_s30  ;;  %p1023_p7 = scmp.ge.s32.totalorder %s1024_s28, %s2759_s30 }
 0x1bf   : >> { %s2838_s23 = smov (%p1033_p9, %s1032_s23), 0  ;;  %1026 = sbr.rel (!%p1023_p7) target bundleno = 444 (0x1bc), region = 331 }
 0x1c0   : >> { %s1365_s5 = sshll.u32 %s2838_s23, 3  ;;  %s1980_s29 = smov %s2838_s23  }
 0x1c1   : >> { %s1037_s18 = scalar_lea.vmem %s1018_s15, %s1365_s5 [#allocation5]   ;;  %s1038_s9 = scalar_lea.vmem %s1020_s8, %s1365_s5  }
 0x1c4 PF: > { %s1994_s11 = smov 1  }
 0x1c5   : > { %s1039_s13 = sshll.u32 %s1994_s11, %s2507_s24 }
 0x1c6   : > { %s1367_s25 = sadd.s32 4294967295, %s1039_s13 }
 0x1c7   : > { %v1049_v42 = vld [vmem:[%s929_s20] sm:%s1367_s25] }
 0x1c8   : > { %1050 = vst [vmem:[%s931_s27] sm:%s1367_s25] %v1049_v42 }
 0x1c9 PF: > { %p1368_p5 = scmp.ge.u32.totalorder %s2830_s7, 8 }
 0x1ca   : > { %s1995_s14 = smov (!%p1368_p5), 1  }
 0x1cb   : > { %799 = sbr.rel (%p1368_p5) target bundleno = 466 (0x1d2), region = 122  ;;  %s800_s12 = sshll.u32 (!%p1368_p5), %s1995_s14, %s2830_s7 }
 0x1cc   : > { %s1369_s10 = sadd.s32 (!%p1368_p5), 4294967295, %s800_s12 }
 0x1d0   : > { %v810_v43 = vld [vmem:[%s2491_s6] sm:%s1369_s10] }
 0x1d1   : > { %811 = vst [vmem:[%s2500_s21] sm:%s1369_s10] %v810_v43 }
 0x1d2 PF: > { %p12_p10 = scmp.ge.s32.totalorder %s2040_s19, 4   ;;  %s2816_s15 = smov %s1853_s16 }
 0x1d3   : > { %s2817_s16 = smov %s2050_s22  ;;  %s2818_s17 = smov %s2040_s19 }
 0x1d4   :  { %14 = sbr.rel (!%p12_p10) target bundleno = 2 (0x2), region = 342 }
 0x1d9   :  { %1064 = vsyncpa [#allocation4], 1 }
 0x1da   :  { %1066 = vsyncpa [#allocation4 + $0x1], 1 }

</bundles_post_ra>
